<compile_context>
chip_gen: v7x
topology: tpu7x:2x2x1
jax: 0.10.0
libtpu: 0.0.40
codegen_flags: <defaults>
</compile_context>

<pallas_src>
import math
from functools import partial

import jax
import jax.numpy as jnp
from jax.experimental import pallas as pl
from jax.experimental.pallas import tpu as pltpu


class GPT2Config:
    def __init__(self):
        # Small synthetic config; vocab kept at the real GPT-2 value so the
        # lm_head padding / vocab-tiling path is actually exercised.
        self.vocab_size = 50257
        self.max_position_embeddings = 64
        self.hidden_size = 64
        self.num_hidden_layers = 2
        self.intermediate_size = 256
        self.layer_norm_epsilon = 1e-5
        self.num_heads = 4


# ------------------------------ small helpers -------------------------------

def _round_up(x, m):
    return ((x + m - 1) // m) * m


def _clamp_vmem(nbytes):
    # 2x safety factor, floor well above the tiny-test need, cap below the
    # smallest physical VMEM (v7x: 64 MiB per TensorCore).
    return int(min(48 << 20, max(8 << 20, 2 * nbytes)))


def _block_vmem_bytes(S, H, I, prev, T, cache_itemsize):
    lane = lambda n: _round_up(max(n, 1), 128)
    sub = lambda n: _round_up(max(n, 1), 8)
    bf16, f32 = 2, 4
    weights = (sub(H) * lane(3 * H) + sub(H) * lane(H)
               + sub(H) * lane(I) + sub(I) * lane(H)) * bf16
    biases = (lane(3 * H) + lane(I) + 6 * lane(H)) * sub(1) * f32
    kv = (sub(prev) + sub(T)) * lane(H) * 2 * cache_itemsize
    act = sub(S) * lane(H) * f32 * 2
    return 2 * (weights + biases + kv) + 2 * act        # x2 = double buffering


def _choose_vocab_tile(V, H, budget_bytes=8 << 20):
    # Double-buffered bf16 wte tile (2 * tv * H * 2 bytes) under budget; cap at
    # 2048 rows to bound the vreg pressure of the (1, tv) logits row.
    tv = budget_bytes // (4 * max(H, 1))
    tv = max(128, min(2048, (tv // 128) * 128))
    return min(tv, _round_up(V, 128))


# --------------------------- fused transformer block ------------------------

def _gpt2_block_kernel(x_emb_ref, past_k_ref, past_v_ref,
                       ln1_g_ref, ln1_b_ref, w_qkv_ref, b_qkv_ref,
                       w_atp_ref, b_atp_ref, ln2_g_ref, ln2_b_ref,
                       w_fc_ref, b_fc_ref, w_mp_ref, b_mp_ref,
                       x_out_ref, k_out_ref, v_out_ref,
                       *, nh, hd, prev, eps):
    l = pl.program_id(0)
    S, H = x_emb_ref.shape
    T = prev + S

    # Initialize the resident (carried) activation from the embeddings at layer 0.
    @pl.when(l == 0)
    def _():
        x_out_ref[...] = x_emb_ref[...]

    x = x_out_ref[...].astype(jnp.float32)

    def layer_norm(v, g_ref, b_ref):
        mean = jnp.mean(v, axis=-1, keepdims=True)
        c = v - mean
        var = jnp.mean(c * c, axis=-1, keepdims=True)
        return c * jax.lax.rsqrt(var + eps) * g_ref[0] + b_ref[0]

    # ----------------------------- attention --------------------------------
    h1 = layer_norm(x, ln1_g_ref, ln1_b_ref)                           # [S, H]
    qkv = jnp.dot(h1.astype(jnp.bfloat16), w_qkv_ref[0],
                  preferred_element_type=jnp.float32) + b_qkv_ref[0]   # [S, 3H]
    q = qkv[:, 0:H] * (1.0 / math.sqrt(hd))      # fold 1/sqrt(hd) into q once
    k_new = qkv[:, H:2 * H]
    v_new = qkv[:, 2 * H:3 * H]

    # Lane-dense KV writeback: one full-block [T, H] store per layer, built in
    # vregs.  Attention below reads k_full/v_full directly (never the output
    # refs), so the cache store is off the critical path.
    if prev > 0:
        k_full = jnp.concatenate([past_k_ref[0].astype(jnp.float32), k_new], axis=0)
        v_full = jnp.concatenate([past_v_ref[0].astype(jnp.float32), v_new], axis=0)
    else:  # TODO(synk): prev == 0 (empty past) would need specs without past refs.
        k_full, v_full = k_new, v_new
    k_out_ref[0] = k_full.astype(k_out_ref.dtype)
    v_out_ref[0] = v_full.astype(v_out_ref.dtype)

    # Head-major [nh, *, hd] operands, bf16 for the MXU (f32 accumulation).
    qh = jnp.stack([q[:, h * hd:(h + 1) * hd] for h in range(nh)],
                   axis=0).astype(jnp.bfloat16)                        # [nh, S, hd]
    kh = jnp.stack([k_full[:, h * hd:(h + 1) * hd] for h in range(nh)],
                   axis=0).astype(jnp.bfloat16)                        # [nh, T, hd]
    vh = jnp.stack([v_full[:, h * hd:(h + 1) * hd] for h in range(nh)],
                   axis=0).astype(jnp.bfloat16)                        # [nh, T, hd]

    s = jnp.einsum('hsd,htd->hst', qh, kh,
                   preferred_element_type=jnp.float32)                 # [nh, S, T]
    rows = jax.lax.broadcasted_iota(jnp.int32, (nh, S, T), 1)
    cols = jax.lax.broadcasted_iota(jnp.int32, (nh, S, T), 2)
    s = jnp.where(cols <= rows + prev, s, -1e30)   # finite causal mask
    m = jnp.max(s, axis=-1, keepdims=True)
    p = jnp.exp(s - m)
    p = p * pl.reciprocal(jnp.sum(p, axis=-1, keepdims=True), approx=True)
    o = jnp.einsum('hst,htd->hsd', p.astype(jnp.bfloat16), vh,
                   preferred_element_type=jnp.float32)                 # [nh, S, hd]
    ctx = jnp.concatenate([o[h] for h in range(nh)], axis=-1)          # [S, H]

    attn = jnp.dot(ctx.astype(jnp.bfloat16), w_atp_ref[0],
                   preferred_element_type=jnp.float32) + b_atp_ref[0]
    x = x + attn

    # -------------------------------- MLP -----------------------------------
    # TODO(synk): at GPT-2 large/XL widths, stream w_fc/w_mp in chunks along the
    # intermediate dim (inner grid axis / emit_pipeline) to keep the
    # double-buffered weight footprint inside scoped VMEM.
    h2 = layer_norm(x, ln2_g_ref, ln2_b_ref)
    fc = jnp.dot(h2.astype(jnp.bfloat16), w_fc_ref[0],
                 preferred_element_type=jnp.float32) + b_fc_ref[0]     # [S, I]
    c0 = math.sqrt(2.0 / math.pi)
    fc = 0.5 * fc * (1.0 + jnp.tanh(c0 * (fc + 0.044715 * fc * fc * fc)))
    mp = jnp.dot(fc.astype(jnp.bfloat16), w_mp_ref[0],
                 preferred_element_type=jnp.float32) + b_mp_ref[0]
    x = x + mp

    x_out_ref[...] = x.astype(x_out_ref.dtype)


# ------------------------ fused ln_f + lm_head + argmax ----------------------

def _lm_head_kernel(x_ref, g_ref, b_ref, w_ref, o_ref, best_val, h_sc, *, eps, V):
    j = pl.program_id(0)
    TV = w_ref.shape[0]

    @pl.when(j == 0)
    def _():
        # ln_f on the last row, computed exactly once (f32 math, bf16 result cached).
        xl = x_ref[...].astype(jnp.float32)                            # [1, H]
        mean = jnp.mean(xl, axis=-1, keepdims=True)
        c = xl - mean
        var = jnp.mean(c * c, axis=-1, keepdims=True)
        h = c * jax.lax.rsqrt(var + eps) * g_ref[...] + b_ref[...]
        h_sc[...] = h.astype(jnp.bfloat16)
        best_val[...] = jnp.full((1, 1), -jnp.inf, jnp.float32)
        o_ref[...] = jnp.zeros((1, 1), jnp.int32)

    # tied lm_head: contract over H against wte [TV, H] (no wte.T materialization).
    logits = jax.lax.dot_general(h_sc[...], w_ref[...],
                                 (((1,), (1,)), ((), ())),
                                 preferred_element_type=jnp.float32)   # [1, TV]

    base = j * TV
    idx = jax.lax.broadcasted_iota(jnp.int32, (1, TV), 1) + base
    logits = jnp.where(idx < V, logits, -jnp.inf)   # mask padded vocab rows
    tile_max = jnp.max(logits, axis=-1, keepdims=True)                 # [1, 1]
    cand = jnp.where(logits == tile_max, idx, jnp.int32(2 ** 30))
    tile_arg = jnp.min(cand, axis=-1, keepdims=True)                   # [1, 1]

    better = tile_max > best_val[...]          # strict > keeps first occurrence
    o_ref[...] = jnp.where(better, tile_arg, o_ref[...])
    best_val[...] = jnp.where(better, tile_max, best_val[...])


# ------------------------------ model (glue) --------------------------------

def init_params(config, key):
    H, I = config.hidden_size, config.intermediate_size
    V, P, L = config.vocab_size, config.max_position_embeddings, config.num_hidden_layers
    ks = jax.random.split(key, 8)

    def norm(k, shape, scale=0.02, dtype=jnp.bfloat16):
        return (scale * jax.random.normal(k, shape, dtype=jnp.float32)).astype(dtype)

    return {
        # bf16 weights (MXU-native); LN params / biases stay f32.
        "wte": norm(ks[0], (V, H)),          # tied with lm_head
        "wpe": norm(ks[1], (P, H)),
        "ln_f_g": jnp.ones((1, H), jnp.float32),
        "ln_f_b": jnp.zeros((1, H), jnp.float32),
        "ln1_g": jnp.ones((L, 1, H), jnp.float32),
        "ln1_b": jnp.zeros((L, 1, H), jnp.float32),
        "ln2_g": jnp.ones((L, 1, H), jnp.float32),
        "ln2_b": jnp.zeros((L, 1, H), jnp.float32),
        "w_qkv": norm(ks[2], (L, H, 3 * H)),
        "b_qkv": jnp.zeros((L, 1, 3 * H), jnp.float32),
        "w_atp": norm(ks[3], (L, H, H)),
        "b_atp": jnp.zeros((L, 1, H), jnp.float32),
        "w_fc": norm(ks[4], (L, H, I)),
        "b_fc": jnp.zeros((L, 1, I), jnp.float32),
        "w_mp": norm(ks[5], (L, I, H)),
        "b_mp": jnp.zeros((L, 1, H), jnp.float32),
    }


def gpt2_lm_head_forward(params, config, input_ids, position_ids, past_keys, past_values):
    H = config.hidden_size
    I = config.intermediate_size
    nh = config.num_heads
    hd = H // nh
    L = config.num_hidden_layers
    eps = config.layer_norm_epsilon
    V = config.vocab_size

    S = input_ids.shape[0]
    prev = past_keys.shape[2]
    T = prev + S

    # Embedding gathers are plain-JAX glue (token-id dependent gather).
    # TODO(synk): a DMA-gather kernel could fold this into the fused block kernel.
    x_emb = (params["wte"][input_ids].astype(jnp.float32)
             + params["wpe"][position_ids].astype(jnp.float32))        # [S, H]

    # Lane-dense [L, prev, H] view of the past caches for the kernel (cheap XLA op).
    past_k_slab = jnp.transpose(past_keys, (0, 2, 1, 3)).reshape(L, prev, H)
    past_v_slab = jnp.transpose(past_values, (0, 2, 1, 3)).reshape(L, prev, H)

    vmem_block = _clamp_vmem(
        _block_vmem_bytes(S, H, I, prev, T, past_keys.dtype.itemsize))

    # ---- fused transformer stack: one pallas_call, grid over layers ----
    # TODO(synk): on v7x, prefill-sized S could add a parallel query-row grid axis
    # to use both TensorCores; the layer axis itself is inherently sequential.
    x_final, k_slab, v_slab = pl.pallas_call(
        partial(_gpt2_block_kernel, nh=nh, hd=hd, prev=prev, eps=eps),
        grid=(L,),
        in_specs=[
            pl.BlockSpec((S, H), lambda l: (0, 0)),                    # x_emb
            pl.BlockSpec((1, prev, H), lambda l: (l, 0, 0)),           # past_k slab
            pl.BlockSpec((1, prev, H), lambda l: (l, 0, 0)),           # past_v slab
            pl.BlockSpec((1, 1, H), lambda l: (l, 0, 0)),              # ln1_g
            pl.BlockSpec((1, 1, H), lambda l: (l, 0, 0)),              # ln1_b
            pl.BlockSpec((1, H, 3 * H), lambda l: (l, 0, 0)),          # w_qkv
            pl.BlockSpec((1, 1, 3 * H), lambda l: (l, 0, 0)),          # b_qkv
            pl.BlockSpec((1, H, H), lambda l: (l, 0, 0)),              # w_atp
            pl.BlockSpec((1, 1, H), lambda l: (l, 0, 0)),              # b_atp
            pl.BlockSpec((1, 1, H), lambda l: (l, 0, 0)),              # ln2_g
            pl.BlockSpec((1, 1, H), lambda l: (l, 0, 0)),              # ln2_b
            pl.BlockSpec((1, H, I), lambda l: (l, 0, 0)),              # w_fc
            pl.BlockSpec((1, 1, I), lambda l: (l, 0, 0)),              # b_fc
            pl.BlockSpec((1, I, H), lambda l: (l, 0, 0)),              # w_mp
            pl.BlockSpec((1, 1, H), lambda l: (l, 0, 0)),              # b_mp
        ],
        out_specs=[
            pl.BlockSpec((S, H), lambda l: (0, 0)),                    # carried x
            pl.BlockSpec((1, T, H), lambda l: (l, 0, 0)),              # k cache slab
            pl.BlockSpec((1, T, H), lambda l: (l, 0, 0)),              # v cache slab
        ],
        out_shape=[
            jax.ShapeDtypeStruct((S, H), jnp.float32),
            jax.ShapeDtypeStruct((L, T, H), past_keys.dtype),
            jax.ShapeDtypeStruct((L, T, H), past_values.dtype),
        ],
        compiler_params=pltpu.CompilerParams(
            dimension_semantics=("arbitrary",),
            vmem_limit_bytes=vmem_block),
    )(x_emb, past_k_slab, past_v_slab,
      params["ln1_g"], params["ln1_b"], params["w_qkv"], params["b_qkv"],
      params["w_atp"], params["b_atp"], params["ln2_g"], params["ln2_b"],
      params["w_fc"], params["b_fc"], params["w_mp"], params["b_mp"])

    # Restore the module's [L, nh, T, hd] cache contract (cheap outside layout op).
    new_k = k_slab.reshape(L, T, nh, hd).transpose(0, 2, 1, 3)
    new_v = v_slab.reshape(L, T, nh, hd).transpose(0, 2, 1, 3)

    # ---- fused ln_f + tied lm_head + argmax, vocab streamed over a grid ----
    tv = _choose_vocab_tile(V, H)
    Vp = _round_up(V, tv)                       # pad vocab to a whole number of tiles
    wte_p = params["wte"]
    if Vp != V:
        wte_p = jnp.pad(wte_p, ((0, Vp - V), (0, 0)))
    x_last = x_final[-1:, :]                    # only the last row feeds the lm_head

    vmem_lm = _clamp_vmem(2 * tv * _round_up(H, 128) * 2 + (1 << 20))

    # TODO(synk): on v7x, a parallel vocab-partition variant (per-tile max/argmax
    # outputs + tiny combine) would use both TensorCores; kept sequential here.
    next_id = pl.pallas_call(
        partial(_lm_head_kernel, eps=eps, V=V),
        grid=(Vp // tv,),
        in_specs=[
            pl.BlockSpec((1, H), lambda j: (0, 0)),                    # x_last
            pl.BlockSpec((1, H), lambda j: (0, 0)),                    # ln_f gamma
            pl.BlockSpec((1, H), lambda j: (0, 0)),                    # ln_f beta
            pl.BlockSpec((tv, H), lambda j: (j, 0)),                   # wte tile
        ],
        out_specs=pl.BlockSpec((1, 1), lambda j: (0, 0)),
        out_shape=jax.ShapeDtypeStruct((1, 1), jnp.int32),
        scratch_shapes=[pltpu.VMEM((1, 1), jnp.float32),               # running max
                        pltpu.VMEM((1, H), jnp.bfloat16)],             # ln_f(last row)
        compiler_params=pltpu.CompilerParams(
            dimension_semantics=("arbitrary",),
            vmem_limit_bytes=vmem_lm),
    )(x_last, params["ln_f_g"], params["ln_f_b"], wte_p)

    updated_input_ids = next_id.reshape(1).astype(input_ids.dtype)
    next_position_ids = position_ids[-1:] + 1
    return updated_input_ids, next_position_ids, new_k, new_v


if __name__ == "__main__":
    config = GPT2Config()
    key = jax.random.PRNGKey(0)
    k_params, k_ids, k_pk, k_pv = jax.random.split(key, 4)

    params = init_params(config, k_params)

    seq = 8
    prev_seq = 4
    nh = config.num_heads
    hd = config.hidden_size // nh
    L = config.num_hidden_layers

    input_ids = jax.random.randint(k_ids, (seq,), 0, config.vocab_size, dtype=jnp.int32)
    position_ids = jnp.arange(prev_seq, prev_seq + seq, dtype=jnp.int32)
    past_keys = (0.02 * jax.random.normal(k_pk, (L, nh, prev_seq, hd))).astype(jnp.float32)
    past_values = (0.02 * jax.random.normal(k_pv, (L, nh, prev_seq, hd))).astype(jnp.float32)

    fwd = jax.jit(lambda p, ii, pi, pk, pv: gpt2_lm_head_forward(p, config, ii, pi, pk, pv))
    out = fwd(params, input_ids, position_ids, past_keys, past_values)
    out = jax.block_until_ready(out)
    upd_ids, upd_pos, upd_k, upd_v = out

    assert upd_ids.shape == (1,) and upd_ids.dtype == jnp.int32
    assert upd_pos.shape == (1,) and int(upd_pos[0]) == prev_seq + seq
    assert upd_k.shape == (L, nh, prev_seq + seq, hd)
    assert upd_v.shape == (L, nh, prev_seq + seq, hd)
    assert 0 <= int(upd_ids[0]) < config.vocab_size
    # Past rows must be carried through unchanged into the updated caches.
    assert bool(jnp.allclose(upd_k[:, :, :prev_seq, :], past_keys, atol=1e-5))
    assert bool(jnp.allclose(upd_v[:, :, :prev_seq, :], past_values, atol=1e-5))

    print("KERNEL_OK")
</pallas_src>

<mosaic_0001>
module attributes {stable_mosaic.version = 11 : i64} {
  func.func @_gpt2_block_kernel(%arg0: i32, %arg1: memref<8x64xf32, #tpu.memory_space<vmem>>, %arg2: memref<1x4x64xf32, #tpu.memory_space<vmem>>, %arg3: memref<1x4x64xf32, #tpu.memory_space<vmem>>, %arg4: memref<1x1x64xf32, #tpu.memory_space<vmem>>, %arg5: memref<1x1x64xf32, #tpu.memory_space<vmem>>, %arg6: memref<1x64x192xbf16, #tpu.memory_space<vmem>>, %arg7: memref<1x1x192xf32, #tpu.memory_space<vmem>>, %arg8: memref<1x64x64xbf16, #tpu.memory_space<vmem>>, %arg9: memref<1x1x64xf32, #tpu.memory_space<vmem>>, %arg10: memref<1x1x64xf32, #tpu.memory_space<vmem>>, %arg11: memref<1x1x64xf32, #tpu.memory_space<vmem>>, %arg12: memref<1x64x256xbf16, #tpu.memory_space<vmem>>, %arg13: memref<1x1x256xf32, #tpu.memory_space<vmem>>, %arg14: memref<1x256x64xbf16, #tpu.memory_space<vmem>>, %arg15: memref<1x1x64xf32, #tpu.memory_space<vmem>>, %arg16: memref<8x64xf32, #tpu.memory_space<vmem>>, %arg17: memref<1x12x64xf32, #tpu.memory_space<vmem>>, %arg18: memref<1x12x64xf32, #tpu.memory_space<vmem>>) attributes {dimension_semantics = [#tpu.dimension_semantics<arbitrary>], iteration_bounds = array<i64: 2>, scalar_prefetch = 0 : i64, scratch_operands = 0 : i64, tpu.core_type = #tpu.core_type<tc>, window_params = [{pipeline_mode = #tpu.pipeline_mode<synchronous>, transform_indices = @transform_0, window_bounds = array<i64: 8, 64>}, {transform_indices = @transform_1, window_bounds = array<i64: 1, 4, 64>}, {transform_indices = @transform_2, window_bounds = array<i64: 1, 4, 64>}, {transform_indices = @transform_3, window_bounds = array<i64: 1, 1, 64>}, {transform_indices = @transform_4, window_bounds = array<i64: 1, 1, 64>}, {transform_indices = @transform_5, window_bounds = array<i64: 1, 64, 192>}, {transform_indices = @transform_6, window_bounds = array<i64: 1, 1, 192>}, {transform_indices = @transform_7, window_bounds = array<i64: 1, 64, 64>}, {transform_indices = @transform_8, window_bounds = array<i64: 1, 1, 64>}, {transform_indices = @transform_9, window_bounds = array<i64: 1, 1, 64>}, {transform_indices = @transform_10, window_bounds = array<i64: 1, 1, 64>}, {transform_indices = @transform_11, window_bounds = array<i64: 1, 64, 256>}, {transform_indices = @transform_12, window_bounds = array<i64: 1, 1, 256>}, {transform_indices = @transform_13, window_bounds = array<i64: 1, 256, 64>}, {transform_indices = @transform_14, window_bounds = array<i64: 1, 1, 64>}, {pipeline_mode = #tpu.pipeline_mode<synchronous>, transform_indices = @transform_15, window_bounds = array<i64: 8, 64>}, {transform_indices = @transform_16, window_bounds = array<i64: 1, 12, 64>}, {transform_indices = @transform_17, window_bounds = array<i64: 1, 12, 64>}]} {
    %c0_i32 = arith.constant 0 : i32
    %0 = arith.cmpi eq, %arg0, %c0_i32 : i32
    %1 = arith.extui %0 : i1 to i32
    %c0_i32_0 = arith.constant 0 : i32
    %2 = arith.cmpi ne, %1, %c0_i32_0 : i32
    scf.if %2 {
      %c0_75 = arith.constant 0 : index
      %c0_76 = arith.constant 0 : index
      %176 = vector.load %arg1[%c0_75, %c0_76] : memref<8x64xf32, #tpu.memory_space<vmem>>, vector<8x64xf32>
      %c0_77 = arith.constant 0 : index
      %c0_78 = arith.constant 0 : index
      %177 = vector.load %arg16[%c0_77, %c0_78] : memref<8x64xf32, #tpu.memory_space<vmem>>, vector<8x64xf32>
      tpu.vector_store %arg16[%c0_77, %c0_78], %176 {strides = array<i32>} : memref<8x64xf32, #tpu.memory_space<vmem>>, vector<8x64xf32>,
    } else {
    }
    %c0 = arith.constant 0 : index
    %c0_1 = arith.constant 0 : index
    %3 = vector.load %arg16[%c0, %c0_1] : memref<8x64xf32, #tpu.memory_space<vmem>>, vector<8x64xf32>
    %cst = arith.constant dense<0.000000e+00> : vector<8xf32>
    %4 = vector.multi_reduction <add>, %3, %cst [1] : vector<8x64xf32> to vector<8xf32>
    %5 = vector.shape_cast %4 : vector<8xf32> to vector<8x1xf32>
    %cst_2 = arith.constant 6.400000e+01 : f32
    %6 = vector.broadcast %cst_2 : f32 to vector<8x1xf32>
    %7 = arith.divf %5, %6 : vector<8x1xf32>
    %8 = vector.broadcast %7 : vector<8x1xf32> to vector<8x64xf32>
    %9 = arith.subf %3, %8 : vector<8x64xf32>
    %10 = arith.mulf %9, %9 : vector<8x64xf32>
    %cst_3 = arith.constant dense<0.000000e+00> : vector<8xf32>
    %11 = vector.multi_reduction <add>, %10, %cst_3 [1] : vector<8x64xf32> to vector<8xf32>
    %12 = vector.shape_cast %11 : vector<8xf32> to vector<8x1xf32>
    %cst_4 = arith.constant 6.400000e+01 : f32
    %13 = vector.broadcast %cst_4 : f32 to vector<8x1xf32>
    %14 = arith.divf %12, %13 : vector<8x1xf32>
    %cst_5 = arith.constant 9.99999974E-6 : f32
    %15 = vector.broadcast %cst_5 : f32 to vector<8x1xf32>
    %16 = arith.addf %14, %15 : vector<8x1xf32>
    %17 = math.rsqrt %16 : vector<8x1xf32>
    %18 = vector.broadcast %17 : vector<8x1xf32> to vector<8x64xf32>
    %19 = arith.mulf %9, %18 : vector<8x64xf32>
    %c0_6 = arith.constant 0 : index
    %c0_7 = arith.constant 0 : index
    %c0_8 = arith.constant 0 : index
    %20 = vector.load %arg4[%c0_6, %c0_7, %c0_8] : memref<1x1x64xf32, #tpu.memory_space<vmem>>, vector<1x1x64xf32>
    %21 = vector.shape_cast %20 : vector<1x1x64xf32> to vector<1x64xf32>
    %22 = vector.broadcast %21 : vector<1x64xf32> to vector<8x64xf32>
    %23 = arith.mulf %19, %22 : vector<8x64xf32>
    %c0_9 = arith.constant 0 : index
    %c0_10 = arith.constant 0 : index
    %c0_11 = arith.constant 0 : index
    %24 = vector.load %arg5[%c0_9, %c0_10, %c0_11] : memref<1x1x64xf32, #tpu.memory_space<vmem>>, vector<1x1x64xf32>
    %25 = vector.shape_cast %24 : vector<1x1x64xf32> to vector<1x64xf32>
    %26 = vector.broadcast %25 : vector<1x64xf32> to vector<8x64xf32>
    %27 = arith.addf %23, %26 : vector<8x64xf32>
    %28 = arith.truncf %27 : vector<8x64xf32> to vector<8x64xbf16>
    %c0_12 = arith.constant 0 : index
    %c0_13 = arith.constant 0 : index
    %c0_14 = arith.constant 0 : index
    %29 = vector.load %arg6[%c0_12, %c0_13, %c0_14] : memref<1x64x192xbf16, #tpu.memory_space<vmem>>, vector<1x64x192xbf16>
    %30 = vector.shape_cast %29 : vector<1x64x192xbf16> to vector<64x192xbf16>
    %cst_15 = arith.constant dense<0.000000e+00> : vector<8x192xf32>
    %31 = tpu.matmul %28, %30, %cst_15 {dimension_numbers = #tpu.dot_dimension_numbers<[1], [0], [0], [1], [0, 0, 1, 1], [], []>} : vector<8x64xbf16>, vector<64x192xbf16>, vector<8x192xf32> -> vector<8x192xf32>
    %c0_16 = arith.constant 0 : index
    %c0_17 = arith.constant 0 : index
    %c0_18 = arith.constant 0 : index
    %32 = vector.load %arg7[%c0_16, %c0_17, %c0_18] : memref<1x1x192xf32, #tpu.memory_space<vmem>>, vector<1x1x192xf32>
    %33 = vector.shape_cast %32 : vector<1x1x192xf32> to vector<1x192xf32>
    %34 = vector.broadcast %33 : vector<1x192xf32> to vector<8x192xf32>
    %35 = arith.addf %31, %34 : vector<8x192xf32>
    %36 = vector.extract_strided_slice %35 {offsets = [0, 0], sizes = [8, 64], strides = [1, 1]} : vector<8x192xf32> to vector<8x64xf32>
    %cst_19 = arith.constant 2.500000e-01 : f32
    %37 = vector.broadcast %cst_19 : f32 to vector<8x64xf32>
    %38 = arith.mulf %36, %37 : vector<8x64xf32>
    %39 = vector.extract_strided_slice %35 {offsets = [0, 64], sizes = [8, 64], strides = [1, 1]} : vector<8x192xf32> to vector<8x64xf32>
    %40 = vector.extract_strided_slice %35 {offsets = [0, 128], sizes = [8, 64], strides = [1, 1]} : vector<8x192xf32> to vector<8x64xf32>
    %c0_20 = arith.constant 0 : index
    %c0_21 = arith.constant 0 : index
    %c0_22 = arith.constant 0 : index
    %41 = vector.load %arg2[%c0_20, %c0_21, %c0_22] : memref<1x4x64xf32, #tpu.memory_space<vmem>>, vector<1x4x64xf32>
    %42 = vector.shape_cast %41 : vector<1x4x64xf32> to vector<4x64xf32>
    %43 = tpu.concatenate %42, %39 in 0 : vector<4x64xf32>, vector<8x64xf32> -> vector<12x64xf32>
    %c0_23 = arith.constant 0 : index
    %c0_24 = arith.constant 0 : index
    %c0_25 = arith.constant 0 : index
    %44 = vector.load %arg3[%c0_23, %c0_24, %c0_25] : memref<1x4x64xf32, #tpu.memory_space<vmem>>, vector<1x4x64xf32>
    %45 = vector.shape_cast %44 : vector<1x4x64xf32> to vector<4x64xf32>
    %46 = tpu.concatenate %45, %40 in 0 : vector<4x64xf32>, vector<8x64xf32> -> vector<12x64xf32>
    %c0_26 = arith.constant 0 : index
    %c0_27 = arith.constant 0 : index
    %c0_28 = arith.constant 0 : index
    %47 = vector.load %arg17[%c0_26, %c0_27, %c0_28] : memref<1x12x64xf32, #tpu.memory_space<vmem>>, vector<1x12x64xf32>
    %48 = vector.shape_cast %47 : vector<1x12x64xf32> to vector<12x64xf32>
    %49 = vector.shape_cast %43 : vector<12x64xf32> to vector<1x12x64xf32>
    tpu.vector_store %arg17[%c0_26, %c0_27, %c0_28], %49 {strides = array<i32>} : memref<1x12x64xf32, #tpu.memory_space<vmem>>, vector<1x12x64xf32>,
    %c0_29 = arith.constant 0 : index
    %c0_30 = arith.constant 0 : index
    %c0_31 = arith.constant 0 : index
    %50 = vector.load %arg18[%c0_29, %c0_30, %c0_31] : memref<1x12x64xf32, #tpu.memory_space<vmem>>, vector<1x12x64xf32>
    %51 = vector.shape_cast %50 : vector<1x12x64xf32> to vector<12x64xf32>
    %52 = vector.shape_cast %46 : vector<12x64xf32> to vector<1x12x64xf32>
    tpu.vector_store %arg18[%c0_29, %c0_30, %c0_31], %52 {strides = array<i32>} : memref<1x12x64xf32, #tpu.memory_space<vmem>>, vector<1x12x64xf32>,
    %53 = vector.extract_strided_slice %38 {offsets = [0, 0], sizes = [8, 16], strides = [1, 1]} : vector<8x64xf32> to vector<8x16xf32>
    %54 = vector.extract_strided_slice %38 {offsets = [0, 16], sizes = [8, 16], strides = [1, 1]} : vector<8x64xf32> to vector<8x16xf32>
    %55 = vector.extract_strided_slice %38 {offsets = [0, 32], sizes = [8, 16], strides = [1, 1]} : vector<8x64xf32> to vector<8x16xf32>
    %56 = vector.extract_strided_slice %38 {offsets = [0, 48], sizes = [8, 16], strides = [1, 1]} : vector<8x64xf32> to vector<8x16xf32>
    %57 = vector.shape_cast %53 : vector<8x16xf32> to vector<1x8x16xf32>
    %58 = vector.shape_cast %54 : vector<8x16xf32> to vector<1x8x16xf32>
    %59 = vector.shape_cast %55 : vector<8x16xf32> to vector<1x8x16xf32>
    %60 = vector.shape_cast %56 : vector<8x16xf32> to vector<1x8x16xf32>
    %61 = tpu.concatenate %57, %58, %59, %60 in 0 : vector<1x8x16xf32>, vector<1x8x16xf32>, vector<1x8x16xf32>, vector<1x8x16xf32> -> vector<4x8x16xf32>
    %62 = arith.truncf %61 : vector<4x8x16xf32> to vector<4x8x16xbf16>
    %63 = vector.extract_strided_slice %43 {offsets = [0, 0], sizes = [12, 16], strides = [1, 1]} : vector<12x64xf32> to vector<12x16xf32>
    %64 = vector.extract_strided_slice %43 {offsets = [0, 16], sizes = [12, 16], strides = [1, 1]} : vector<12x64xf32> to vector<12x16xf32>
    %65 = vector.extract_strided_slice %43 {offsets = [0, 32], sizes = [12, 16], strides = [1, 1]} : vector<12x64xf32> to vector<12x16xf32>
    %66 = vector.extract_strided_slice %43 {offsets = [0, 48], sizes = [12, 16], strides = [1, 1]} : vector<12x64xf32> to vector<12x16xf32>
    %67 = vector.shape_cast %63 : vector<12x16xf32> to vector<1x12x16xf32>
    %68 = vector.shape_cast %64 : vector<12x16xf32> to vector<1x12x16xf32>
    %69 = vector.shape_cast %65 : vector<12x16xf32> to vector<1x12x16xf32>
    %70 = vector.shape_cast %66 : vector<12x16xf32> to vector<1x12x16xf32>
    %71 = tpu.concatenate %67, %68, %69, %70 in 0 : vector<1x12x16xf32>, vector<1x12x16xf32>, vector<1x12x16xf32>, vector<1x12x16xf32> -> vector<4x12x16xf32>
    %72 = arith.truncf %71 : vector<4x12x16xf32> to vector<4x12x16xbf16>
    %73 = vector.extract_strided_slice %46 {offsets = [0, 0], sizes = [12, 16], strides = [1, 1]} : vector<12x64xf32> to vector<12x16xf32>
    %74 = vector.extract_strided_slice %46 {offsets = [0, 16], sizes = [12, 16], strides = [1, 1]} : vector<12x64xf32> to vector<12x16xf32>
    %75 = vector.extract_strided_slice %46 {offsets = [0, 32], sizes = [12, 16], strides = [1, 1]} : vector<12x64xf32> to vector<12x16xf32>
    %76 = vector.extract_strided_slice %46 {offsets = [0, 48], sizes = [12, 16], strides = [1, 1]} : vector<12x64xf32> to vector<12x16xf32>
    %77 = vector.shape_cast %73 : vector<12x16xf32> to vector<1x12x16xf32>
    %78 = vector.shape_cast %74 : vector<12x16xf32> to vector<1x12x16xf32>
    %79 = vector.shape_cast %75 : vector<12x16xf32> to vector<1x12x16xf32>
    %80 = vector.shape_cast %76 : vector<12x16xf32> to vector<1x12x16xf32>
    %81 = tpu.concatenate %77, %78, %79, %80 in 0 : vector<1x12x16xf32>, vector<1x12x16xf32>, vector<1x12x16xf32>, vector<1x12x16xf32> -> vector<4x12x16xf32>
    %82 = arith.truncf %81 : vector<4x12x16xf32> to vector<4x12x16xbf16>
    "tpu.trace_start"() <{level = 10 : i32, message = "hsd,htd->hst"}> : () -> ()
    %cst_32 = arith.constant dense<0.000000e+00> : vector<4x8x12xf32>
    %83 = tpu.matmul %62, %72, %cst_32 {dimension_numbers = #tpu.dot_dimension_numbers<[2], [2], [1], [1], [0, 0, 0, 1, 1, 1], [0], [0]>} : vector<4x8x16xbf16>, vector<4x12x16xbf16>, vector<4x8x12xf32> -> vector<4x8x12xf32>
    "tpu.trace_stop"() : () -> ()
    %84 = tpu.iota {dimensions = array<i32: 1>} : vector<4x8x12xi32>
    %85 = tpu.iota {dimensions = array<i32: 2>} : vector<4x8x12xi32>
    %c4_i32 = arith.constant 4 : i32
    %86 = vector.broadcast %c4_i32 : i32 to vector<4x8x12xi32>
    %87 = arith.addi %84, %86 : vector<4x8x12xi32>
    %88 = arith.cmpi sle, %85, %87 : vector<4x8x12xi32>
    %cst_33 = arith.constant -1.000000e+30 : f32
    %89 = vector.broadcast %cst_33 : f32 to vector<4x8x12xf32>
    %90 = arith.select %88, %83, %89 : vector<4x8x12xi1>, vector<4x8x12xf32>
    %cst_34 = arith.constant dense<0xFF800000> : vector<4x8xf32>
    %91 = vector.multi_reduction <maximumf>, %90, %cst_34 [2] : vector<4x8x12xf32> to vector<4x8xf32>
    %92 = vector.shape_cast %91 : vector<4x8xf32> to vector<4x8x1xf32>
    %93 = vector.broadcast %92 : vector<4x8x1xf32> to vector<4x8x12xf32>
    %94 = arith.subf %90, %93 : vector<4x8x12xf32>
    %95 = math.exp %94 : vector<4x8x12xf32>
    %cst_35 = arith.constant dense<0.000000e+00> : vector<4x8xf32>
    %96 = vector.multi_reduction <add>, %95, %cst_35 [2] : vector<4x8x12xf32> to vector<4x8xf32>
    %97 = vector.shape_cast %96 : vector<4x8xf32> to vector<4x8x1xf32>
    %98 = tpu.reciprocal %97 {approx = true} : vector<4x8x1xf32> -> vector<4x8x1xf32>
    %99 = vector.broadcast %98 : vector<4x8x1xf32> to vector<4x8x12xf32>
    %100 = arith.mulf %95, %99 : vector<4x8x12xf32>
    %101 = arith.truncf %100 : vector<4x8x12xf32> to vector<4x8x12xbf16>
    "tpu.trace_start"() <{level = 10 : i32, message = "hst,htd->hsd"}> : () -> ()
    %cst_36 = arith.constant dense<0.000000e+00> : vector<4x8x16xf32>
    %102 = tpu.matmul %101, %82, %cst_36 {dimension_numbers = #tpu.dot_dimension_numbers<[2], [1], [1], [2], [0, 0, 0, 1, 1, 2], [0], [0]>} : vector<4x8x12xbf16>, vector<4x12x16xbf16>, vector<4x8x16xf32> -> vector<4x8x16xf32>
    "tpu.trace_stop"() : () -> ()
    %103 = vector.extract_strided_slice %102 {offsets = [0, 0, 0], sizes = [1, 8, 16], strides = [1, 1, 1]} : vector<4x8x16xf32> to vector<1x8x16xf32>
    %104 = vector.shape_cast %103 : vector<1x8x16xf32> to vector<8x16xf32>
    %105 = vector.extract_strided_slice %102 {offsets = [1, 0, 0], sizes = [1, 8, 16], strides = [1, 1, 1]} : vector<4x8x16xf32> to vector<1x8x16xf32>
    %106 = vector.shape_cast %105 : vector<1x8x16xf32> to vector<8x16xf32>
    %107 = vector.extract_strided_slice %102 {offsets = [2, 0, 0], sizes = [1, 8, 16], strides = [1, 1, 1]} : vector<4x8x16xf32> to vector<1x8x16xf32>
    %108 = vector.shape_cast %107 : vector<1x8x16xf32> to vector<8x16xf32>
    %109 = vector.extract_strided_slice %102 {offsets = [3, 0, 0], sizes = [1, 8, 16], strides = [1, 1, 1]} : vector<4x8x16xf32> to vector<1x8x16xf32>
    %110 = vector.shape_cast %109 : vector<1x8x16xf32> to vector<8x16xf32>
    %111 = tpu.concatenate %104, %106, %108, %110 in 1 : vector<8x16xf32>, vector<8x16xf32>, vector<8x16xf32>, vector<8x16xf32> -> vector<8x64xf32>
    %112 = arith.truncf %111 : vector<8x64xf32> to vector<8x64xbf16>
    %c0_37 = arith.constant 0 : index
    %c0_38 = arith.constant 0 : index
    %c0_39 = arith.constant 0 : index
    %113 = vector.load %arg8[%c0_37, %c0_38, %c0_39] : memref<1x64x64xbf16, #tpu.memory_space<vmem>>, vector<1x64x64xbf16>
    %114 = vector.shape_cast %113 : vector<1x64x64xbf16> to vector<64x64xbf16>
    %cst_40 = arith.constant dense<0.000000e+00> : vector<8x64xf32>
    %115 = tpu.matmul %112, %114, %cst_40 {dimension_numbers = #tpu.dot_dimension_numbers<[1], [0], [0], [1], [0, 0, 1, 1], [], []>} : vector<8x64xbf16>, vector<64x64xbf16>, vector<8x64xf32> -> vector<8x64xf32>
    %c0_41 = arith.constant 0 : index
    %c0_42 = arith.constant 0 : index
    %c0_43 = arith.constant 0 : index
    %116 = vector.load %arg9[%c0_41, %c0_42, %c0_43] : memref<1x1x64xf32, #tpu.memory_space<vmem>>, vector<1x1x64xf32>
    %117 = vector.shape_cast %116 : vector<1x1x64xf32> to vector<1x64xf32>
    %118 = vector.broadcast %117 : vector<1x64xf32> to vector<8x64xf32>
    %119 = arith.addf %115, %118 : vector<8x64xf32>
    %120 = arith.addf %3, %119 : vector<8x64xf32>
    %cst_44 = arith.constant dense<0.000000e+00> : vector<8xf32>
    %121 = vector.multi_reduction <add>, %120, %cst_44 [1] : vector<8x64xf32> to vector<8xf32>
    %122 = vector.shape_cast %121 : vector<8xf32> to vector<8x1xf32>
    %cst_45 = arith.constant 6.400000e+01 : f32
    %123 = vector.broadcast %cst_45 : f32 to vector<8x1xf32>
    %124 = arith.divf %122, %123 : vector<8x1xf32>
    %125 = vector.broadcast %124 : vector<8x1xf32> to vector<8x64xf32>
    %126 = arith.subf %120, %125 : vector<8x64xf32>
    %127 = arith.mulf %126, %126 : vector<8x64xf32>
    %cst_46 = arith.constant dense<0.000000e+00> : vector<8xf32>
    %128 = vector.multi_reduction <add>, %127, %cst_46 [1] : vector<8x64xf32> to vector<8xf32>
    %129 = vector.shape_cast %128 : vector<8xf32> to vector<8x1xf32>
    %cst_47 = arith.constant 6.400000e+01 : f32
    %130 = vector.broadcast %cst_47 : f32 to vector<8x1xf32>
    %131 = arith.divf %129, %130 : vector<8x1xf32>
    %cst_48 = arith.constant 9.99999974E-6 : f32
    %132 = vector.broadcast %cst_48 : f32 to vector<8x1xf32>
    %133 = arith.addf %131, %132 : vector<8x1xf32>
    %134 = math.rsqrt %133 : vector<8x1xf32>
    %135 = vector.broadcast %134 : vector<8x1xf32> to vector<8x64xf32>
    %136 = arith.mulf %126, %135 : vector<8x64xf32>
    %c0_49 = arith.constant 0 : index
    %c0_50 = arith.constant 0 : index
    %c0_51 = arith.constant 0 : index
    %137 = vector.load %arg10[%c0_49, %c0_50, %c0_51] : memref<1x1x64xf32, #tpu.memory_space<vmem>>, vector<1x1x64xf32>
    %138 = vector.shape_cast %137 : vector<1x1x64xf32> to vector<1x64xf32>
    %139 = vector.broadcast %138 : vector<1x64xf32> to vector<8x64xf32>
    %140 = arith.mulf %136, %139 : vector<8x64xf32>
    %c0_52 = arith.constant 0 : index
    %c0_53 = arith.constant 0 : index
    %c0_54 = arith.constant 0 : index
    %141 = vector.load %arg11[%c0_52, %c0_53, %c0_54] : memref<1x1x64xf32, #tpu.memory_space<vmem>>, vector<1x1x64xf32>
    %142 = vector.shape_cast %141 : vector<1x1x64xf32> to vector<1x64xf32>
    %143 = vector.broadcast %142 : vector<1x64xf32> to vector<8x64xf32>
    %144 = arith.addf %140, %143 : vector<8x64xf32>
    %145 = arith.truncf %144 : vector<8x64xf32> to vector<8x64xbf16>
    %c0_55 = arith.constant 0 : index
    %c0_56 = arith.constant 0 : index
    %c0_57 = arith.constant 0 : index
    %146 = vector.load %arg12[%c0_55, %c0_56, %c0_57] : memref<1x64x256xbf16, #tpu.memory_space<vmem>>, vector<1x64x256xbf16>
    %147 = vector.shape_cast %146 : vector<1x64x256xbf16> to vector<64x256xbf16>
    %cst_58 = arith.constant dense<0.000000e+00> : vector<8x256xf32>
    %148 = tpu.matmul %145, %147, %cst_58 {dimension_numbers = #tpu.dot_dimension_numbers<[1], [0], [0], [1], [0, 0, 1, 1], [], []>} : vector<8x64xbf16>, vector<64x256xbf16>, vector<8x256xf32> -> vector<8x256xf32>
    %c0_59 = arith.constant 0 : index
    %c0_60 = arith.constant 0 : index
    %c0_61 = arith.constant 0 : index
    %149 = vector.load %arg13[%c0_59, %c0_60, %c0_61] : memref<1x1x256xf32, #tpu.memory_space<vmem>>, vector<1x1x256xf32>
    %150 = vector.shape_cast %149 : vector<1x1x256xf32> to vector<1x256xf32>
    %151 = vector.broadcast %150 : vector<1x256xf32> to vector<8x256xf32>
    %152 = arith.addf %148, %151 : vector<8x256xf32>
    %cst_62 = arith.constant 5.000000e-01 : f32
    %153 = vector.broadcast %cst_62 : f32 to vector<8x256xf32>
    %154 = arith.mulf %153, %152 : vector<8x256xf32>
    %cst_63 = arith.constant 4.471500e-02 : f32
    %155 = vector.broadcast %cst_63 : f32 to vector<8x256xf32>
    %156 = arith.mulf %155, %152 : vector<8x256xf32>
    %157 = arith.mulf %156, %152 : vector<8x256xf32>
    %158 = arith.mulf %157, %152 : vector<8x256xf32>
    %159 = arith.addf %152, %158 : vector<8x256xf32>
    %cst_64 = arith.constant 0.797884583 : f32
    %160 = vector.broadcast %cst_64 : f32 to vector<8x256xf32>
    %161 = arith.mulf %160, %159 : vector<8x256xf32>
    %162 = math.tanh %161 : vector<8x256xf32>
    %cst_65 = arith.constant 1.000000e+00 : f32
    %163 = vector.broadcast %cst_65 : f32 to vector<8x256xf32>
    %164 = arith.addf %163, %162 : vector<8x256xf32>
    %165 = arith.mulf %154, %164 : vector<8x256xf32>
    %166 = arith.truncf %165 : vector<8x256xf32> to vector<8x256xbf16>
    %c0_66 = arith.constant 0 : index
    %c0_67 = arith.constant 0 : index
    %c0_68 = arith.constant 0 : index
    %167 = vector.load %arg14[%c0_66, %c0_67, %c0_68] : memref<1x256x64xbf16, #tpu.memory_space<vmem>>, vector<1x256x64xbf16>
    %168 = vector.shape_cast %167 : vector<1x256x64xbf16> to vector<256x64xbf16>
    %cst_69 = arith.constant dense<0.000000e+00> : vector<8x64xf32>
    %169 = tpu.matmul %166, %168, %cst_69 {dimension_numbers = #tpu.dot_dimension_numbers<[1], [0], [0], [1], [0, 0, 1, 1], [], []>} : vector<8x256xbf16>, vector<256x64xbf16>, vector<8x64xf32> -> vector<8x64xf32>
    %c0_70 = arith.constant 0 : index
    %c0_71 = arith.constant 0 : index
    %c0_72 = arith.constant 0 : index
    %170 = vector.load %arg15[%c0_70, %c0_71, %c0_72] : memref<1x1x64xf32, #tpu.memory_space<vmem>>, vector<1x1x64xf32>
    %171 = vector.shape_cast %170 : vector<1x1x64xf32> to vector<1x64xf32>
    %172 = vector.broadcast %171 : vector<1x64xf32> to vector<8x64xf32>
    %173 = arith.addf %169, %172 : vector<8x64xf32>
    %174 = arith.addf %120, %173 : vector<8x64xf32>
    %c0_73 = arith.constant 0 : index
    %c0_74 = arith.constant 0 : index
    %175 = vector.load %arg16[%c0_73, %c0_74] : memref<8x64xf32, #tpu.memory_space<vmem>>, vector<8x64xf32>
    tpu.vector_store %arg16[%c0_73, %c0_74], %174 {strides = array<i32>} : memref<8x64xf32, #tpu.memory_space<vmem>>, vector<8x64xf32>,
    return
  }
  func.func @transform_0(%arg0: i32) -> (i32, i32) {
    %c0_i32 = arith.constant 0 : i32
    %c0_i32_0 = arith.constant 0 : i32
    %c0_i32_1 = arith.constant 0 : i32
    return %c0_i32, %c0_i32_0 : i32, i32
  }
  func.func @transform_1(%arg0: i32) -> (i32, i32, i32) {
    %c0_i32 = arith.constant 0 : i32
    %c0_i32_0 = arith.constant 0 : i32
    %c0_i32_1 = arith.constant 0 : i32
    return %arg0, %c0_i32, %c0_i32_0 : i32, i32, i32
  }
  func.func @transform_2(%arg0: i32) -> (i32, i32, i32) {
    %c0_i32 = arith.constant 0 : i32
    %c0_i32_0 = arith.constant 0 : i32
    %c0_i32_1 = arith.constant 0 : i32
    return %arg0, %c0_i32, %c0_i32_0 : i32, i32, i32
  }
  func.func @transform_3(%arg0: i32) -> (i32, i32, i32) {
    %c0_i32 = arith.constant 0 : i32
    %c0_i32_0 = arith.constant 0 : i32
    %c0_i32_1 = arith.constant 0 : i32
    return %arg0, %c0_i32, %c0_i32_0 : i32, i32, i32
  }
  func.func @transform_4(%arg0: i32) -> (i32, i32, i32) {
    %c0_i32 = arith.constant 0 : i32
    %c0_i32_0 = arith.constant 0 : i32
    %c0_i32_1 = arith.constant 0 : i32
    return %arg0, %c0_i32, %c0_i32_0 : i32, i32, i32
  }
  func.func @transform_5(%arg0: i32) -> (i32, i32, i32) {
    %c0_i32 = arith.constant 0 : i32
    %c0_i32_0 = arith.constant 0 : i32
    %c0_i32_1 = arith.constant 0 : i32
    return %arg0, %c0_i32, %c0_i32_0 : i32, i32, i32
  }
  func.func @transform_6(%arg0: i32) -> (i32, i32, i32) {
    %c0_i32 = arith.constant 0 : i32
    %c0_i32_0 = arith.constant 0 : i32
    %c0_i32_1 = arith.constant 0 : i32
    return %arg0, %c0_i32, %c0_i32_0 : i32, i32, i32
  }
  func.func @transform_7(%arg0: i32) -> (i32, i32, i32) {
    %c0_i32 = arith.constant 0 : i32
    %c0_i32_0 = arith.constant 0 : i32
    %c0_i32_1 = arith.constant 0 : i32
    return %arg0, %c0_i32, %c0_i32_0 : i32, i32, i32
  }
  func.func @transform_8(%arg0: i32) -> (i32, i32, i32) {
    %c0_i32 = arith.constant 0 : i32
    %c0_i32_0 = arith.constant 0 : i32
    %c0_i32_1 = arith.constant 0 : i32
    return %arg0, %c0_i32, %c0_i32_0 : i32, i32, i32
  }
  func.func @transform_9(%arg0: i32) -> (i32, i32, i32) {
    %c0_i32 = arith.constant 0 : i32
    %c0_i32_0 = arith.constant 0 : i32
    %c0_i32_1 = arith.constant 0 : i32
    return %arg0, %c0_i32, %c0_i32_0 : i32, i32, i32
  }
  func.func @transform_10(%arg0: i32) -> (i32, i32, i32) {
    %c0_i32 = arith.constant 0 : i32
    %c0_i32_0 = arith.constant 0 : i32
    %c0_i32_1 = arith.constant 0 : i32
    return %arg0, %c0_i32, %c0_i32_0 : i32, i32, i32
  }
  func.func @transform_11(%arg0: i32) -> (i32, i32, i32) {
    %c0_i32 = arith.constant 0 : i32
    %c0_i32_0 = arith.constant 0 : i32
    %c0_i32_1 = arith.constant 0 : i32
    return %arg0, %c0_i32, %c0_i32_0 : i32, i32, i32
  }
  func.func @transform_12(%arg0: i32) -> (i32, i32, i32) {
    %c0_i32 = arith.constant 0 : i32
    %c0_i32_0 = arith.constant 0 : i32
    %c0_i32_1 = arith.constant 0 : i32
    return %arg0, %c0_i32, %c0_i32_0 : i32, i32, i32
  }
  func.func @transform_13(%arg0: i32) -> (i32, i32, i32) {
    %c0_i32 = arith.constant 0 : i32
    %c0_i32_0 = arith.constant 0 : i32
    %c0_i32_1 = arith.constant 0 : i32
    return %arg0, %c0_i32, %c0_i32_0 : i32, i32, i32
  }
  func.func @transform_14(%arg0: i32) -> (i32, i32, i32) {
    %c0_i32 = arith.constant 0 : i32
    %c0_i32_0 = arith.constant 0 : i32
    %c0_i32_1 = arith.constant 0 : i32
    return %arg0, %c0_i32, %c0_i32_0 : i32, i32, i32
  }
  func.func @transform_15(%arg0: i32) -> (i32, i32) {
    %c0_i32 = arith.constant 0 : i32
    %c0_i32_0 = arith.constant 0 : i32
    %c0_i32_1 = arith.constant 0 : i32
    return %c0_i32, %c0_i32_0 : i32, i32
  }
  func.func @transform_16(%arg0: i32) -> (i32, i32, i32) {
    %c0_i32 = arith.constant 0 : i32
    %c0_i32_0 = arith.constant 0 : i32
    %c0_i32_1 = arith.constant 0 : i32
    return %arg0, %c0_i32, %c0_i32_0 : i32, i32, i32
  }
  func.func @transform_17(%arg0: i32) -> (i32, i32, i32) {
    %c0_i32 = arith.constant 0 : i32
    %c0_i32_0 = arith.constant 0 : i32
    %c0_i32_1 = arith.constant 0 : i32
    return %arg0, %c0_i32, %c0_i32_0 : i32, i32, i32
  }
}

module attributes {stable_mosaic.version = 11 : i64} {
  func.func @_lm_head_kernel(%arg0: i32, %arg1: memref<1x64xf32, #tpu.memory_space<vmem>>, %arg2: memref<1x64xf32, #tpu.memory_space<vmem>>, %arg3: memref<1x64xf32, #tpu.memory_space<vmem>>, %arg4: memref<2048x64xbf16, #tpu.memory_space<vmem>>, %arg5: memref<1x1xi32, #tpu.memory_space<vmem>>, %arg6: memref<1x1xf32, #tpu.memory_space<vmem>>, %arg7: memref<1x64xbf16, #tpu.memory_space<vmem>>) attributes {dimension_semantics = [#tpu.dimension_semantics<arbitrary>], iteration_bounds = array<i64: 25>, scalar_prefetch = 0 : i64, scratch_operands = 2 : i64, tpu.core_type = #tpu.core_type<tc>, window_params = [{pipeline_mode = #tpu.pipeline_mode<synchronous>, transform_indices = @transform_0, window_bounds = array<i64: 1, 64>}, {pipeline_mode = #tpu.pipeline_mode<synchronous>, transform_indices = @transform_1, window_bounds = array<i64: 1, 64>}, {pipeline_mode = #tpu.pipeline_mode<synchronous>, transform_indices = @transform_2, window_bounds = array<i64: 1, 64>}, {transform_indices = @transform_3, window_bounds = array<i64: 2048, 64>}, {pipeline_mode = #tpu.pipeline_mode<synchronous>, transform_indices = @transform_4, window_bounds = array<i64: 1, 1>}]} {
    %c0_i32 = arith.constant 0 : i32
    %0 = arith.cmpi eq, %arg0, %c0_i32 : i32
    %1 = arith.extui %0 : i1 to i32
    %c0_i32_0 = arith.constant 0 : i32
    %2 = arith.cmpi ne, %1, %c0_i32_0 : i32
    scf.if %2 {
      %c0_17 = arith.constant 0 : index
      %c0_18 = arith.constant 0 : index
      %30 = vector.load %arg1[%c0_17, %c0_18] : memref<1x64xf32, #tpu.memory_space<vmem>>, vector<1x64xf32>
      %cst_19 = arith.constant dense<0.000000e+00> : vector<1xf32>
      %31 = vector.multi_reduction <add>, %30, %cst_19 [1] : vector<1x64xf32> to vector<1xf32>
      %32 = vector.shape_cast %31 : vector<1xf32> to vector<1x1xf32>
      %cst_20 = arith.constant 6.400000e+01 : f32
      %33 = vector.broadcast %cst_20 : f32 to vector<1x1xf32>
      %34 = arith.divf %32, %33 : vector<1x1xf32>
      %35 = vector.broadcast %34 : vector<1x1xf32> to vector<1x64xf32>
      %36 = arith.subf %30, %35 : vector<1x64xf32>
      %37 = arith.mulf %36, %36 : vector<1x64xf32>
      %cst_21 = arith.constant dense<0.000000e+00> : vector<1xf32>
      %38 = vector.multi_reduction <add>, %37, %cst_21 [1] : vector<1x64xf32> to vector<1xf32>
      %39 = vector.shape_cast %38 : vector<1xf32> to vector<1x1xf32>
      %cst_22 = arith.constant 6.400000e+01 : f32
      %40 = vector.broadcast %cst_22 : f32 to vector<1x1xf32>
      %41 = arith.divf %39, %40 : vector<1x1xf32>
      %cst_23 = arith.constant 9.99999974E-6 : f32
      %42 = vector.broadcast %cst_23 : f32 to vector<1x1xf32>
      %43 = arith.addf %41, %42 : vector<1x1xf32>
      %44 = math.rsqrt %43 : vector<1x1xf32>
      %45 = vector.broadcast %44 : vector<1x1xf32> to vector<1x64xf32>
      %46 = arith.mulf %36, %45 : vector<1x64xf32>
      %c0_24 = arith.constant 0 : index
      %c0_25 = arith.constant 0 : index
      %47 = vector.load %arg2[%c0_24, %c0_25] : memref<1x64xf32, #tpu.memory_space<vmem>>, vector<1x64xf32>
      %48 = arith.mulf %46, %47 : vector<1x64xf32>
      %c0_26 = arith.constant 0 : index
      %c0_27 = arith.constant 0 : index
      %49 = vector.load %arg3[%c0_26, %c0_27] : memref<1x64xf32, #tpu.memory_space<vmem>>, vector<1x64xf32>
      %50 = arith.addf %48, %49 : vector<1x64xf32>
      %51 = arith.truncf %50 : vector<1x64xf32> to vector<1x64xbf16>
      %c0_28 = arith.constant 0 : index
      %c0_29 = arith.constant 0 : index
      %52 = vector.load %arg7[%c0_28, %c0_29] : memref<1x64xbf16, #tpu.memory_space<vmem>>, vector<1x64xbf16>
      tpu.vector_store %arg7[%c0_28, %c0_29], %51 {strides = array<i32>} : memref<1x64xbf16, #tpu.memory_space<vmem>>, vector<1x64xbf16>,
      %cst_30 = arith.constant 0xFF800000 : f32
      %53 = vector.broadcast %cst_30 : f32 to vector<1x1xf32>
      %c0_31 = arith.constant 0 : index
      %c0_32 = arith.constant 0 : index
      %54 = vector.load %arg6[%c0_31, %c0_32] : memref<1x1xf32, #tpu.memory_space<vmem>>, vector<1x1xf32>
      tpu.vector_store %arg6[%c0_31, %c0_32], %53 {strides = array<i32>} : memref<1x1xf32, #tpu.memory_space<vmem>>, vector<1x1xf32>,
      %c0_i32_33 = arith.constant 0 : i32
      %55 = vector.broadcast %c0_i32_33 : i32 to vector<1x1xi32>
      %c0_34 = arith.constant 0 : index
      %c0_35 = arith.constant 0 : index
      %56 = vector.load %arg5[%c0_34, %c0_35] : memref<1x1xi32, #tpu.memory_space<vmem>>, vector<1x1xi32>
      tpu.vector_store %arg5[%c0_34, %c0_35], %55 {strides = array<i32>} : memref<1x1xi32, #tpu.memory_space<vmem>>, vector<1x1xi32>,
    } else {
    }
    %c0 = arith.constant 0 : index
    %c0_1 = arith.constant 0 : index
    %3 = vector.load %arg7[%c0, %c0_1] : memref<1x64xbf16, #tpu.memory_space<vmem>>, vector<1x64xbf16>
    %c0_2 = arith.constant 0 : index
    %c0_3 = arith.constant 0 : index
    %4 = vector.load %arg4[%c0_2, %c0_3] : memref<2048x64xbf16, #tpu.memory_space<vmem>>, vector<2048x64xbf16>
    %cst = arith.constant dense<0.000000e+00> : vector<1x2048xf32>
    %5 = tpu.matmul %3, %4, %cst {dimension_numbers = #tpu.dot_dimension_numbers<[1], [1], [0], [0], [0, 0, 1, 0], [], []>} : vector<1x64xbf16>, vector<2048x64xbf16>, vector<1x2048xf32> -> vector<1x2048xf32>
    %c2048_i32 = arith.constant 2048 : i32
    %6 = arith.muli %arg0, %c2048_i32 : i32
    %7 = tpu.iota {dimensions = array<i32: 1>} : vector<1x2048xi32>
    %8 = vector.broadcast %6 : i32 to vector<1x2048xi32>
    %9 = arith.addi %7, %8 : vector<1x2048xi32>
    %c50257_i32 = arith.constant 50257 : i32
    %10 = vector.broadcast %c50257_i32 : i32 to vector<1x2048xi32>
    %11 = arith.cmpi slt, %9, %10 : vector<1x2048xi32>
    %cst_4 = arith.constant 0xFF800000 : f32
    %12 = vector.broadcast %cst_4 : f32 to vector<1x2048xf32>
    %13 = arith.select %11, %5, %12 : vector<1x2048xi1>, vector<1x2048xf32>
    %cst_5 = arith.constant dense<0xFF800000> : vector<1xf32>
    %14 = vector.multi_reduction <maximumf>, %13, %cst_5 [1] : vector<1x2048xf32> to vector<1xf32>
    %15 = vector.shape_cast %14 : vector<1xf32> to vector<1x1xf32>
    %16 = vector.broadcast %15 : vector<1x1xf32> to vector<1x2048xf32>
    %17 = arith.cmpf oeq, %13, %16 : vector<1x2048xf32>
    %c1073741824_i32 = arith.constant 1073741824 : i32
    %18 = vector.broadcast %c1073741824_i32 : i32 to vector<1x2048xi32>
    %19 = arith.select %17, %9, %18 : vector<1x2048xi1>, vector<1x2048xi32>
    %cst_6 = arith.constant dense<2147483647> : vector<1xi32>
    %20 = vector.multi_reduction <minsi>, %19, %cst_6 [1] : vector<1x2048xi32> to vector<1xi32>
    %21 = vector.shape_cast %20 : vector<1xi32> to vector<1x1xi32>
    %c0_7 = arith.constant 0 : index
    %c0_8 = arith.constant 0 : index
    %22 = vector.load %arg6[%c0_7, %c0_8] : memref<1x1xf32, #tpu.memory_space<vmem>>, vector<1x1xf32>
    %23 = arith.cmpf ogt, %15, %22 : vector<1x1xf32>
    %c0_9 = arith.constant 0 : index
    %c0_10 = arith.constant 0 : index
    %24 = vector.load %arg5[%c0_9, %c0_10] : memref<1x1xi32, #tpu.memory_space<vmem>>, vector<1x1xi32>
    %25 = arith.select %23, %21, %24 : vector<1x1xi1>, vector<1x1xi32>
    %c0_11 = arith.constant 0 : index
    %c0_12 = arith.constant 0 : index
    %26 = vector.load %arg5[%c0_11, %c0_12] : memref<1x1xi32, #tpu.memory_space<vmem>>, vector<1x1xi32>
    tpu.vector_store %arg5[%c0_11, %c0_12], %25 {strides = array<i32>} : memref<1x1xi32, #tpu.memory_space<vmem>>, vector<1x1xi32>,
    %c0_13 = arith.constant 0 : index
    %c0_14 = arith.constant 0 : index
    %27 = vector.load %arg6[%c0_13, %c0_14] : memref<1x1xf32, #tpu.memory_space<vmem>>, vector<1x1xf32>
    %28 = arith.select %23, %15, %27 : vector<1x1xi1>, vector<1x1xf32>
    %c0_15 = arith.constant 0 : index
    %c0_16 = arith.constant 0 : index
    %29 = vector.load %arg6[%c0_15, %c0_16] : memref<1x1xf32, #tpu.memory_space<vmem>>, vector<1x1xf32>
    tpu.vector_store %arg6[%c0_15, %c0_16], %28 {strides = array<i32>} : memref<1x1xf32, #tpu.memory_space<vmem>>, vector<1x1xf32>,
    return
  }
  func.func @transform_0(%arg0: i32) -> (i32, i32) {
    %c0_i32 = arith.constant 0 : i32
    %c0_i32_0 = arith.constant 0 : i32
    %c0_i32_1 = arith.constant 0 : i32
    return %c0_i32, %c0_i32_0 : i32, i32
  }
  func.func @transform_1(%arg0: i32) -> (i32, i32) {
    %c0_i32 = arith.constant 0 : i32
    %c0_i32_0 = arith.constant 0 : i32
    %c0_i32_1 = arith.constant 0 : i32
    return %c0_i32, %c0_i32_0 : i32, i32
  }
  func.func @transform_2(%arg0: i32) -> (i32, i32) {
    %c0_i32 = arith.constant 0 : i32
    %c0_i32_0 = arith.constant 0 : i32
    %c0_i32_1 = arith.constant 0 : i32
    return %c0_i32, %c0_i32_0 : i32, i32
  }
  func.func @transform_3(%arg0: i32) -> (i32, i32) {
    %c0_i32 = arith.constant 0 : i32
    %c0_i32_0 = arith.constant 0 : i32
    return %arg0, %c0_i32 : i32, i32
  }
  func.func @transform_4(%arg0: i32) -> (i32, i32) {
    %c0_i32 = arith.constant 0 : i32
    %c0_i32_0 = arith.constant 0 : i32
    %c0_i32_1 = arith.constant 0 : i32
    return %c0_i32, %c0_i32_0 : i32, i32
  }
}

</mosaic_0001>

<bundles_post_ra>
// kernel: _lambda_.2
= control target key start
LH: loop header
LB: loop body
LE: loop exit
PB: predicated region body
PF: predicated region fallthrough
CT: control target
= control target key end

     0   :  { %s2498_s24 = smov 0   ;;  %s2792_s0 = inlined_call_operand.vmem [shape: f32[8,64], index: 0, kind: input, shape index: {}]   ;;  %s2793_s1 = inlined_call_operand.vmem [shape: f32[2,4,64], index: 1, kind: input, shape index: {}]   ;;  %s2794_s2 = inlined_call_operand.vmem [shape: f32[2,4,64], index: 2, kind: input, shape index: {}]   ;;  %s2795_s3 = inlined_call_operand.vmem [shape: f32[2,1,64], index: 3, kind: input, shape index: {}]   ;;  %s2796_s4 = inlined_call_operand.vmem [shape: f32[2,1,64], index: 4, kind: input, shape index: {}]   ;;  %s2797_s5 = inlined_call_operand.vmem [shape: bf16[2,64,192], index: 5, kind: input, shape index: {}]   ;;  %s2798_s6 = inlined_call_operand.vmem [shape: f32[2,1,192], index: 6, kind: input, shape index: {}]   ;;  %s2799_s7 = inlined_call_operand.vmem [shape: bf16[2,64,64], index: 7, kind: input, shape index: {}]   ;;  %s2800_s8 = inlined_call_operand.vmem [shape: f32[2,1,64], index: 8, kind: input, shape index: {}]   ;;  %s2801_s9 = inlined_call_operand.vmem [shape: f32[2,1,64], index: 9, kind: input, shape index: {}]   ;;  %s2802_s10 = inlined_call_operand.vmem [shape: f32[2,1,64], index: 10, kind: input, shape index: {}]   ;;  %s2803_s11 = inlined_call_operand.vmem [shape: bf16[2,64,256], index: 11, kind: input, shape index: {}]   ;;  %s2804_s12 = inlined_call_operand.vmem [shape: f32[2,1,256], index: 12, kind: input, shape index: {}]   ;;  %s2805_s13 = inlined_call_operand.vmem [shape: bf16[2,256,64], index: 13, kind: input, shape index: {}]   ;;  %s2806_s14 = inlined_call_operand.vmem [shape: f32[2,1,64], index: 14, kind: input, shape index: {}]   ;;  %s2807_s15 = inlined_call_operand.vmem [shape: f32[8,64], index: 15, kind: output, shape index: {0}]   ;;  %s2808_s16 = inlined_call_operand.vmem [shape: f32[2,12,64], index: 16, kind: output, shape index: {1}]   ;;  %s2809_s17 = inlined_call_operand.vmem [shape: f32[2,12,64], index: 17, kind: output, shape index: {2}]  }
   0x1   :  { %2813 = sst [smem:[#allocation6_spill]] %s2792_s0 }
   0x2   :  { %2814 = sst [smem:[#allocation7_spill]] %s2793_s1 }
   0x3   :  { %2815 = sst [smem:[#allocation8_spill]] %s2794_s2 }
   0x4   :  { %2816 = sst [smem:[#allocation9_spill]] %s2795_s3 }
   0x5   :  { %2817 = sst [smem:[#allocation10_spill]] %s2796_s4 }
   0x6   :  { %2818 = sst [smem:[#allocation11_spill]] %s2797_s5 }
   0x7   :  { %2819 = sst [smem:[#allocation12_spill]] %s2798_s6 }
   0x8   :  { %2820 = sst [smem:[#allocation13_spill]] %s2799_s7 }
   0x9   :  { %2821 = sst [smem:[#allocation14_spill]] %s2807_s15 }
   0xa LB: > { %2822 = sst [smem:[#allocation2_spill]] %s2396_s24  ;;  %s2504_s25 = sadd.s32 4294967295, %s2396_s24   ;;  %s2396_s24 = sphi %s2498_s24, %s28_s24  }
   0xb   : > { %2823 = sst [smem:[#allocation3_spill]] %s2504_s25  ;;  %p2092_p0 = scmp.ge.s32.totalorder %s2396_s24, 1 }
   0xc   : > { %p601_p1 = scmp.lt.s32.totalorder %s2396_s24, 3 }
   0xe   : > { %p602_p2 = pnand %p2092_p0, %p601_p1 }
  0x10   : > { %605 = sbr.rel (%p602_p2) target bundleno = 2695 (0xa87), region = 80 }
  0x17   : > { %p707_p3 = scmp.lt.s32.totalorder %s2504_s25, 1  ;;  %s2825_s19 = sld [smem:[#allocation7_spill]] }
  0x18   : > { %s2827_s2 = sld [smem:[#allocation8_spill]]  ;;  %s2830_s5 = sld [smem:[#allocation11_spill]] }
  0x19   : > { %s2510_s26 = scalar_select %p707_p3, %s2504_s25, 1 }
  0x1a   : > { %s2831_s6 = sld [smem:[#allocation12_spill]]  ;;  %s2832_s7 = sld [smem:[#allocation13_spill]] }
  0x1b   : > { %s2093_s27 = sshll.u32 %s2510_s26, 2  ;;  %s2165_s25 = sshll.u32 %s2510_s26, 6 }
  0x1c   : > { %s2097_s30 = sshll.u32 %s2510_s26, 1  ;;  %s2166_s20 = sshll.u32 %s2510_s26, 5 }
  0x1d   : > { %s2520_s1 = scalar_lea.vmem %s2825_s19, %s2093_s27  ;;  %s2564_s3 = scalar_lea.vmem %s2803_s11, %s2165_s25 }
  0x1e   : > { %2826 = sst [smem:[#allocation4_spill]] %s2520_s1  ;;  %s2525_s22 = scalar_lea.vmem %s2827_s2, %s2093_s27 }
  0x1f   : > { %2828 = sst [smem:[#allocation5_spill]] %s2525_s22  ;;  %s2535_s0 = scalar_lea.vmem %s2830_s5, %s2165_s25 }
  0x20   : > { %s2541_s1 = scalar_lea.vmem %s2831_s6, %s2097_s30  ;;  %s2547_s2 = scalar_lea.vmem %s2832_s7, %s2166_s20 }
  0x21   : > { %s2569_s21 = scalar_lea.vmem %s2804_s12, %s2097_s30  ;;  %s2168_s24 = sshll.u32 %s2510_s26, 7 }
  0x22   : > { %s2579_s4 = scalar_lea.vmem %s2805_s13, %s2168_s24  ;;  %s2169_s5 = sshll.u32 %s2510_s26, 4 }
  0x23   : > { %s2585_s25 = scalar_lea.vmem %s2808_s16, %s2169_s5  ;;  %s2590_s30 = scalar_lea.vmem %s2809_s17, %s2169_s5 }
  0x24   : > { %s2833_s20 = sld [smem:[#allocation3_spill]] }
  0x2a   : > { %p2109_p4 = scmp.ne.s32.totalorder %s2833_s20, 0 }
  0x2b   : > { %s2834_s22 = sld [smem:[#allocation6_spill]] (!%p2109_p4)  ;;  %vm777_vm0 = vcmask (!%p2109_p4), 523264  }
  0x2c   : > { %775 = sbr.rel (%p2109_p4) target bundleno = 51 (0x33), region = 84  ;;  %s2835_s28 = sld [smem:[#allocation14_spill]] (!%p2109_p4) }
  0x31   : > { %v776_v0 = vld [vmem:[%s2834_s22] sm:$0xff] (!%p2109_p4) }
  0x32   : > { %778 = vst.msk [vmem:[%s2835_s28] sm:$0xff] (!%p2109_p4), %vm777_vm0, %v776_v0 }
  0x33 PF: > { %s2836_s7 = sld [smem:[#allocation14_spill]]  ;;  %vm780_vm1 = vcmask 523264   ;;  %v2322_v8 = vld [vmem:[%s2535_s0 + $0x4] ss:$8 sps:$4 sm:$0xff]   ;;  %v2324_v9 = vld [vmem:[%s2535_s0] ss:$8 sps:$4 sm:$0xff]   ;;  %v822_v27 = vlaneseq  ;;  %s2844_s15 = scalar_lea.vmem %s2801_s9, %s2510_s26 }
  0x34   : > { %v2325_v10 = vld [vmem:[%s2535_s0 + $0x14] ss:$8 sps:$4 sm:$0xff]   ;;  %875 = vmatprep.subr.bf16.mxu1 %v2322_v8  ;;  %v2327_v11 = vld [vmem:[%s2535_s0 + $0x10] ss:$8 sps:$4 sm:$0xff]   ;;  %v2398_v12 = vmov 0   ;;  %s2837_s19 = sld [smem:[#allocation9_spill]] }
  0x35   : > { %876 = vmatpush1.bf16.msra.mxu1 %v2324_v9  ;;  %907 = vmatprep.mubr.bf16.mxu1 %v2398_v12  ;;  %v2328_v13 = vld [vmem:[%s2535_s0 + $0x24] ss:$8 sps:$4 sm:$0xff]   ;;  %v2330_v14 = vld [vmem:[%s2535_s0 + $0x20] ss:$8 sps:$4 sm:$0xff]   ;;  %v2331_v15 = vld [vmem:[%s2535_s0 + $0x34] ss:$8 sps:$4 sm:$0xff]  }
  0x36   : > { %877 = vmatprep.subr.bf16.mxu1 %v2325_v10  ;;  %v2333_v16 = vld [vmem:[%s2535_s0 + $0x30] ss:$8 sps:$4 sm:$0xff]   ;;  %s2839_s23 = sld [smem:[#allocation10_spill]]  ;;  %v2629_v28 = vshrl.u32 %v822_v27, 7  ;;  %v2399_v30 = vmov 0.0   ;;  %s2841_s0 = sld [smem:[#allocation5_spill]] }
  0x37   : > { %2226 = vmatprep.subr.bf16.mxu0 %v2399_v30  ;;  %v820_v31 = vld [vmem:[%s2541_s1] sm:$0x3]  ;;  %vm2400_vm2 = vmmov 0   ;;  %s2842_s1 = sld [smem:[#allocation4_spill]]  ;;  %vm931_vm3 = vcmask 519168   ;;  %vm923_vm4 = vcmask 1043456  }
  0x38   : > { %v824_v29 = vsub.s32 0, %v2629_v28  ;;  %v828_v32 = vsub.s32 1, %v2629_v28  ;;  %2228 = vmatprep.mubr.msk.bf16.mxu0 %vm2400_vm2, %v2399_v30  ;;  %s2401_s24 = smov 64   ;;  %vm995_vm5 = vcmask 130048   ;;  %s2402_s28 = smov 96   ;;  %vm1242_vm6 = vcmask 1045504  }
  0x39   : > { %v2602_v1 = vld [vmem:[%s2836_s7] sm:$0xff]  ;;  %878 = vmatpush1.bf16.msra.mxu1 %v2327_v11  ;;  %s2403_s18 = smov 112   ;;  %vm1190_vm8 = vcmask 97280   ;;  %s2406_s6 = smov 32   ;;  %vm1437_vm9 = vcmask 261120   ;;  %vm1439_vm10 = vcmask 392192  }
  0x3a   : > { %v781_v2 = vsel %vm780_vm1, %v2602_v1, 0.0  ;;  %879 = vmatprep.subr.bf16.mxu1 %v2328_v13  ;;  %s2838_s27 = scalar_lea.vmem %s2837_s19, %s2510_s26  ;;  %v825_v33 = vrot.slane %v820_v31, %v824_v29  ;;  %v829_v34 = vrot.slane %v820_v31, %v828_v32  ;;  %s2407_s22 = smov 48  }
  0x3b   : > { %782 = vadd.xlane.f32.xlu0 %v781_v2  ;;  %v2110_v21 = vld [vmem:[%s2838_s27] ss:$0 sm:$0xff]  ;;  %s2843_s19 = scalar_lea.vmem %s2800_s8, %s2510_s26 }
  0x3c   : > { %s2840_s29 = scalar_lea.vmem %s2839_s23, %s2510_s26  ;;  %v925_v42 = vld [vmem:[%s2841_s0] sm:$0xf]  ;;  %s2846_s0 = scalar_lea.vmem %s2806_s14, %s2510_s26 }
  0x3d   : > { %880 = vmatpush1.bf16.msra.mxu1 %v2330_v14  ;;  %v2111_v23 = vld [vmem:[%s2840_s29] ss:$0 sm:$0xff]  ;;  %s2845_s29 = scalar_lea.vmem %s2802_s10, %s2510_s26 }
  0x3e   : > { %881 = vmatprep.subr.bf16.mxu1 %v2331_v15  ;;  %v917_v47 = vld [vmem:[%s2842_s1] sm:$0xf]  ;;  %v1183_v15 = vand.u32 127, %v822_v27 }
  0x41   : > { %882 = vmatpush1.bf16.msra.mxu1 %v2333_v16  ;;  %v1184_v16 = vadd.s32 4, %v2629_v28 }
  0x42   : > { %2214 = vmatprep.subr.bf16.mxu1 %v2399_v30 }
  0x43   : > { %vm1185_vm7 = vcmp.le.s32.totalorder %v1183_v15, %v1184_v16 }
  0xc8   : > { %v783_v3 = vpop.xlane.xlu0 %782 }
  0xc9   : > { %v785_v4 = vmul.f32 0.015625, %v783_v3 }
  0xcb   : > { %v786_v5 = vsub.f32 %v2602_v1, %v785_v4 }
  0xcd   : > { %v787_v6 = vmul.f32 %v786_v5, %v786_v5 }
  0xcf   : > { %v788_v7 = vsel %vm780_vm1, %v787_v6, 0.0 }
  0xd0   : > { %789 = vadd.xlane.f32.xlu0 %v788_v7 }
 0x15d   : > { %v790_v17 = vpop.xlane.xlu0 %789 }
 0x15e   : > { %v791_v18 = vmul.f32 0.015625, %v790_v17 }
 0x160   : > { %v792_v19 = vadd.f32 1e-05, %v791_v18 }
 0x162   : > { %2366 = vrsqrt.f32 %v792_v19 }
 0x16c   : > { %v2367_v20 = vpop.eup %2366 }
 0x16d   : > { %v794_v22 = vmul.f32 %v2367_v20, %v786_v5 }
 0x16f   : > { %v802_v24 = vmul.f32 %v2110_v21, %v794_v22 }
 0x171   : > { %v810_v25 = vadd.f32 %v2111_v23, %v802_v24 }
 0x173   : > { %v811_v26 = vpack.c.bf16 %v810_v25, %v810_v25 }
 0x175   : > { %2120 = vmatmul.mubr.msk.bf16.vlgmr.msra.gmra.mrb[0].mxu1 %vm780_vm1, %v811_v26 }
 0x176   : > { %2216 = vmatprep.mubr.msk.bf16.mxu1 %vm2400_vm2, %v2399_v30 }
 0x248   : > { %v909_v35 = vpop.f32.mrb[0].mxu1 }
 0x249   : > { %v910_v36 = vadd.f32 %v909_v35, %v825_v33  ;;  %v911_v37 = vpop.f32.mrb[1].mxu1 }
 0x24a   : > { %v912_v38 = vadd.f32 %v911_v37, %v829_v34  ;;  %v913_v39 = vpop.f32.mrb[2].mxu1 }
 0x24b   : > { %v914_v40 = vpop.f32.mrb[3].mxu1  ;;  %v919_v41 = vrot.slane %v910_v36, 4  ;;  %v916_v53 = vmul.f32 0.25, %v910_v36 }
 0x24c   : > { %v927_v43 = vrot.slane %v912_v38, 4 }
 0x24d   : > { %920 = vrot.lane.b32.xlu1 %v919_v41, %s2401_s24  ;;  %v945_v54 = vpack.c.bf16 %v916_v53, %v916_v53 }
 0x24e   : > { %934 = vst.msk [vmem:[%s2590_s30 + $0x8] sm:$0xf] %vm931_vm3, %v927_v43  ;;  %v929_v44 = vsel %vm923_vm4, %v925_v42, %v927_v43 }
 0x24f   : > { %933 = vst.msk [vmem:[%s2590_s30] sm:$0xff] %vm780_vm1, %v929_v44  ;;  %v991_v45 = vpack.c.bf16 %v927_v43, %v929_v44  ;;  %v2648_v46 = vpack.i.bf16 %v927_v43, %v929_v44  ;;  %s2404_s30 = smov 80  }
 0x251   : > { %v1244_v11 = vsel %vm1242_vm6, %v991_v45, 0 }
 0x2bf   : > { %v921_v48 = vpop.permute.xlu1 %920 }
 0x2c0   : > { %932 = vst.msk [vmem:[%s2585_s25 + $0x8] sm:$0xf] %vm931_vm3, %v921_v48  ;;  %v924_v49 = vsel %vm923_vm4, %v917_v47, %v921_v48 }
 0x2c1   : > { %v2297_v50 = vpack.i.bf16 %v921_v48, %v924_v49  ;;  %930 = vst.msk [vmem:[%s2585_s25] sm:$0xff] %vm780_vm1, %v924_v49  ;;  %v968_v51 = vpack.c.bf16 %v921_v48, %v924_v49  ;;  %s2405_s25 = smov 16  }
 0x2c3   : > { %2298 = vrot.lane.b32.xlu0 %v2297_v50, %s2402_s28  ;;  %2293 = vrot.lane.b32.xlu1 %v2297_v50, %s2403_s18  ;;  %v1000_v52 = vsel %vm995_vm5, %v968_v51, 0 }
 0x2c4   : > { %2215 = vmatpush3.bf16.xpose.msra.mxu1 %v1000_v52 }
 0x2c5   : > { %2220 = vmatprep.subr.bf16.mxu1 %v2399_v30 }
 0x2c7   : > { %936 = vrot.lane.b32.xlu1 %v916_v53, %s2403_s18 }
 0x2cb   : > { %2303 = vrot.lane.b32.xlu1 %v2297_v50, %s2404_s30  ;;  %2217 = vmatmul.mubr.msk.bf16.vlgmr.msra.gmra.mrb[4].mxu1 %vm995_vm5, %v945_v54 }
 0x2cc   : > { %2222 = vmatprep.mubr.msk.bf16.mxu1 %vm2400_vm2, %v2399_v30 }
 0x2cf   : > { %939 = vrot.lane.b32.xlu1 %v916_v53, %s2402_s28 }
 0x2d3   : > { %942 = vrot.lane.b32.xlu1 %v916_v53, %s2404_s30 }
 0x335   : > { %v2299_v55 = vpop.permute.xlu0 %2298  ;;  %v2294_v56 = vpop.permute.xlu1 %2293 }
 0x336   : > { %v2301_v57 = vunpack.i.h.bf16 %v2299_v55  ;;  %v2300_v58 = vunpack.i.l.bf16 %v2299_v55  ;;  %v2296_v59 = vunpack.i.h.bf16 %v2294_v56  ;;  %v2295_v60 = vunpack.i.l.bf16 %v2294_v56 }
 0x338   : > { %v969_v61 = vpack.c.bf16 %v2296_v59, %v2295_v60  ;;  %v970_v62 = vpack.c.bf16 %v2301_v57, %v2300_v58 }
 0x339   : > { %v937_v63 = vpop.permute.xlu1 %936 }
 0x33a   : > { %v1046_v0 = vsel %vm995_vm5, %v969_v61, 0  ;;  %v1092_v2 = vsel %vm995_vm5, %v970_v62, 0  ;;  %v946_v6 = vpack.c.bf16 %v937_v63, %v937_v63 }
 0x33b   : > { %2221 = vmatpush3.bf16.xpose.msra.mxu1 %v1046_v0  ;;  %2227 = vmatpush3.bf16.xpose.msra.mxu0 %v1092_v2 }
 0x33c   : > { %2232 = vmatprep.subr.bf16.mxu1 %v2399_v30  ;;  %2238 = vmatprep.subr.bf16.mxu0 %v2399_v30 }
 0x33d   : > { %v2304_v3 = vpop.permute.xlu1 %2303 }
 0x33e   : > { %v2306_v4 = vunpack.i.h.bf16 %v2304_v3  ;;  %v2305_v5 = vunpack.i.l.bf16 %v2304_v3 }
 0x340   : > { %v971_v7 = vpack.c.bf16 %v2306_v4, %v2305_v5 }
 0x341   : > { %v940_v8 = vpop.permute.xlu1 %939 }
 0x342   : > { %v947_v9 = vpack.c.bf16 %v940_v8, %v940_v8  ;;  %2223 = vmatmul.mubr.msk.bf16.vlgmr.msra.gmra.mrb[8].mxu1 %vm995_vm5, %v946_v6  ;;  %v1138_v10 = vsel %vm995_vm5, %v971_v7, 0 }
 0x343   : > { %2233 = vmatpush3.bf16.xpose.msra.mxu1 %v1138_v10  ;;  %2234 = vmatprep.mubr.msk.bf16.mxu1 %vm2400_vm2, %v2399_v30 }
 0x344   : > { %2229 = vmatmul.mubr.msk.bf16.vlgmr.msra.gmra.mrb[0].mxu0 %vm995_vm5, %v947_v9  ;;  %2244 = vmatprep.subr.bf16.mxu1 %v2399_v30 }
 0x345   : > { %2239 = vmatpush3.bf16.msra.mxu0 %v1244_v11  ;;  %v943_v13 = vpop.permute.xlu1 %942  ;;  %2240 = vmatprep.mubr.msk.bf16.mxu0 %vm2400_vm2, %v2399_v30 }
 0x346   : > { %2250 = vmatprep.subr.bf16.mxu0 %v2399_v30  ;;  %v948_v14 = vpack.c.bf16 %v943_v13, %v943_v13 }
 0x34a   : > { %2235 = vmatmul.mubr.msk.bf16.vlgmr.msra.gmra.mrb[12].mxu1 %vm995_vm5, %v948_v14 }
 0x34b   : > { %2246 = vmatprep.mubr.msk.bf16.mxu1 %vm2400_vm2, %v2399_v30 }
 0x39e   : > { %v1036_v17 = vpop.f32.mrb[4].mxu1 }
 0x39f   : > { %v1186_v18 = vsel %vm1185_vm7, %v1036_v17, -1e+30  ;;  %v2218_v19 = vpop.f32.mrb[5].mxu1 }
 0x3a0   : > { %v1039_v20 = vpop.f32.mrb[6].mxu1  ;;  %v1191_v21 = vsel %vm1190_vm8, %v1186_v18, -inf }
 0x3a1   : > { %1192 = vmax.xlane.f32.xlu1 %v1191_v21  ;;  %v2219_v22 = vpop.f32.mrb[7].mxu1 }
 0x415   : > { %v1082_v23 = vpop.f32.mrb[8].mxu1 }
 0x416   : > { %v1187_v24 = vsel %vm1185_vm7, %v1082_v23, -1e+30  ;;  %v2224_v25 = vpop.f32.mrb[9].mxu1 }
 0x417   : > { %v1085_v26 = vpop.f32.mrb[10].mxu1  ;;  %v1128_v31 = vpop.f32.mrb[0].mxu0  ;;  %v1194_v27 = vsel %vm1190_vm8, %v1187_v24, -inf }
 0x418   : > { %v1188_v33 = vsel %vm1185_vm7, %v1128_v31, -1e+30  ;;  %v2230_v34 = vpop.f32.mrb[1].mxu0  ;;  %1195 = vmax.xlane.f32.xlu0 %v1194_v27  ;;  %v2225_v35 = vpop.f32.mrb[11].mxu1 }
 0x419   : > { %v1131_v36 = vpop.f32.mrb[2].mxu0  ;;  %v1197_v37 = vsel %vm1190_vm8, %v1188_v33, -inf }
 0x41a   : > { %v2231_v38 = vpop.f32.mrb[3].mxu0  ;;  %1198 = vmax.xlane.f32.xlu1 %v1197_v37 }
 0x41b   : > { %v2334_v38 = vld [vmem:[%s2547_s2] sm:$0xff]  }
 0x41d   : > { %v1174_v39 = vpop.f32.mrb[12].mxu1 }
 0x41e   : > { %v1189_v40 = vsel %vm1185_vm7, %v1174_v39, -1e+30  ;;  %v2236_v41 = vpop.f32.mrb[13].mxu1 }
 0x41f   : > { %v1177_v42 = vpop.f32.mrb[14].mxu1  ;;  %v1200_v43 = vsel %vm1190_vm8, %v1189_v40, -inf }
 0x420   : > { %1201 = vmax.xlane.f32.xlu0 %v1200_v43  ;;  %v2237_v44 = vpop.f32.mrb[15].mxu1  ;;  %v2335_v43 = vld [vmem:[%s2547_s2 + $0x8] sm:$0xff]  }
 0x421   : > { %v2336_v44 = vld [vmem:[%s2547_s2 + $0x10] sm:$0xff]  }
 0x42b   : > { %2308 = vrot.lane.b32.xlu1 %v2648_v46, %s2403_s18 }
 0x42e   : > { %v1193_v45 = vpop.xlane.xlu1 %1192 }
 0x42f   : > { %v1203_v47 = vsub.f32 %v1186_v18, %v1193_v45  ;;  %v2337_v45 = vld [vmem:[%s2547_s2 + $0x18] sm:$0xff]  }
 0x431   : > { %v1207_v48 = vmul.f32 1.442695, %v1203_v47 }
 0x433   : > { %2368 = vpow2.f32 %v1207_v48 }
 0x43d   : > { %v2369_v49 = vpop.eup %2368 }
 0x43e   : > { %v1215_v50 = vsel %vm1190_vm8, %v2369_v49, 0.0 }
 0x44f   : > { %1216 = vadd.xlane.f32.xlu1 %v1215_v50 }
 0x4a5   : > { %v1196_v51 = vpop.xlane.xlu0 %1195 }
 0x4a6   : > { %v1204_v52 = vsub.f32 %v1187_v24, %v1196_v51 }
 0x4a7   : > { %v1199_v53 = vpop.xlane.xlu1 %1198 }
 0x4a8   : > { %v1209_v54 = vmul.f32 1.442695, %v1204_v52  ;;  %v1205_v55 = vsub.f32 %v1188_v33, %v1199_v53 }
 0x4aa   : > { %2370 = vpow2.f32 %v1209_v54  ;;  %v1211_v56 = vmul.f32 1.442695, %v1205_v55 }
 0x4ab   : > { %v2309_v57 = vpop.permute.xlu1 %2308 }
 0x4ac   : > { %2372 = vpow2.f32 %v1211_v56  ;;  %v2311_v58 = vunpack.i.h.bf16 %v2309_v57  ;;  %v2310_v59 = vunpack.i.l.bf16 %v2309_v57 }
 0x4ad   : > { %v1202_v60 = vpop.xlane.xlu0 %1201 }
 0x4ae   : > { %v992_v61 = vpack.c.bf16 %v2311_v58, %v2310_v59  ;;  %v1206_v62 = vsub.f32 %v1189_v40, %v1202_v60 }
 0x4b0   : > { %v1213_v63 = vmul.f32 1.442695, %v1206_v62  ;;  %v1290_v0 = vsel %vm1242_vm6, %v992_v61, 0 }
 0x4b1   : > { %2245 = vmatpush3.bf16.msra.mxu1 %v1290_v0  ;;  %v2129_v0 = vld [vmem:[%s2843_s19] ss:$0 sm:$0xff] }
 0x4b2   : > { %2374 = vpow2.f32 %v1213_v63  ;;  %2256 = vmatprep.subr.bf16.mxu1 %v2399_v30 }
 0x4b4   : > { %v2371_v2 = vpop.eup %2370 }
 0x4b5   : > { %v1218_v3 = vsel %vm1190_vm8, %v2371_v2, 0.0 }
 0x4b6   : > { %v2373_v4 = vpop.eup %2372  ;;  %1219 = vadd.xlane.f32.xlu0 %v1218_v3 }
 0x4b7   : > { %v1221_v5 = vsel %vm1190_vm8, %v2373_v4, 0.0 }
 0x4b8   : > { %1222 = vadd.xlane.f32.xlu1 %v1221_v5 }
 0x4bc   : > { %v2375_v6 = vpop.eup %2374 }
 0x4bd   : > { %v1224_v7 = vsel %vm1190_vm8, %v2375_v6, 0.0 }
 0x4be   : > { %1225 = vadd.xlane.f32.xlu0 %v1224_v7 }
 0x4c9   : > { %2318 = vrot.lane.b32.xlu1 %v2648_v46, %s2404_s30 }
 0x4d4   : > { %2313 = vrot.lane.b32.xlu0 %v2648_v46, %s2402_s28 }
 0x4dc   : > { %v1217_v8 = vpop.xlane.xlu1 %1216 }
 0x4dd   : > { %2376 = vrcp.f32 %v1217_v8 }
 0x4e7   : > { %v2377_v9 = vpop.eup %2376 }
 0x4e8   : > { %v1231_v10 = vmul.f32 %v2377_v9, %v2369_v49 }
 0x4ea   : > { %v1235_v11 = vpack.c.bf16 %v1231_v10, %v1231_v10 }
 0x4ec   : > { %2241 = vmatmul.mubr.msk.bf16.vlgmr.msra.gmra.mrb[4].mxu0 %vm1190_vm8, %v1235_v11 }
 0x4ed   : > { %2252 = vmatprep.mubr.msk.bf16.mxu0 %vm2400_vm2, %v2399_v30 }
 0x543   : > { %v1220_v13 = vpop.xlane.xlu0 %1219 }
 0x544   : > { %2378 = vrcp.f32 %v1220_v13 }
 0x545   : > { %v1223_v14 = vpop.xlane.xlu1 %1222 }
 0x546   : > { %2380 = vrcp.f32 %v1223_v14 }
 0x549   : > { %v2319_v15 = vpop.permute.xlu1 %2318 }
 0x54a   : > { %v2321_v16 = vunpack.i.h.bf16 %v2319_v15  ;;  %v2320_v17 = vunpack.i.l.bf16 %v2319_v15  ;;  %v2340_v15 = vld [vmem:[%s2564_s3 + $0x4] ss:$8 sps:$4 sm:$0xff]  }
 0x54b   : > { %v1226_v18 = vpop.xlane.xlu0 %1225 }
 0x54c   : > { %2382 = vrcp.f32 %v1226_v18  ;;  %v994_v20 = vpack.c.bf16 %v2321_v16, %v2320_v17  ;;  %v2343_v16 = vld [vmem:[%s2564_s3 + $0x14] ss:$8 sps:$4 sm:$0xff]   ;;  %v2341_v17 = vld [vmem:[%s2564_s3 + $0x10] ss:$8 sps:$4 sm:$0xff]   ;;  %v2346_v18 = vld [vmem:[%s2564_s3 + $0x24] ss:$8 sps:$4 sm:$0xff]  }
 0x54e   : > { %v2379_v46 = vpop.eup %2378  ;;  %v1382_v27 = vsel %vm1242_vm6, %v994_v20, 0  ;;  %v2349_v20 = vld [vmem:[%s2564_s3 + $0x34] ss:$8 sps:$4 sm:$0xff]  }
 0x54f   : > { %v1232_v19 = vmul.f32 %v2379_v46, %v2371_v2  ;;  %v2314_v21 = vpop.permute.xlu0 %2313  ;;  %v2344_v46 = vld [vmem:[%s2564_s3 + $0x20] ss:$8 sps:$4 sm:$0xff]  }
 0x550   : > { %v2381_v22 = vpop.eup %2380  ;;  %v2316_v23 = vunpack.i.h.bf16 %v2314_v21  ;;  %v2315_v24 = vunpack.i.l.bf16 %v2314_v21 }
 0x551   : > { %v1236_v25 = vpack.c.bf16 %v1232_v19, %v1232_v19  ;;  %v1233_v26 = vmul.f32 %v2381_v22, %v2373_v4  ;;  %v2347_v19 = vld [vmem:[%s2564_s3 + $0x30] ss:$8 sps:$4 sm:$0xff]  }
 0x552   : > { %v993_v31 = vpack.c.bf16 %v2316_v23, %v2315_v24 }
 0x553   : > { %2247 = vmatmul.mubr.msk.bf16.vlgmr.msra.gmra.mrb[16].mxu1 %vm1190_vm8, %v1236_v25  ;;  %v1237_v35 = vpack.c.bf16 %v1233_v26, %v1233_v26  ;;  %v2135_v25 = vld [vmem:[%s2844_s15] ss:$0 sm:$0xff] }
 0x554   : > { %2257 = vmatpush3.bf16.msra.mxu1 %v1382_v27  ;;  %v1336_v33 = vsel %vm1242_vm6, %v993_v31, 0  ;;  %2258 = vmatprep.mubr.msk.bf16.mxu1 %vm2400_vm2, %v2399_v30  ;;  %v2136_v31 = vld [vmem:[%s2845_s29] ss:$0 sm:$0xff] }
 0x555   : > { %2251 = vmatpush3.bf16.msra.mxu0 %v1336_v33  ;;  %1618 = vmatprep.subr.bf16.mxu1 %v2340_v15 }
 0x556   : > { %v2383_v34 = vpop.eup %2382  ;;  %2262 = vmatprep.subr.bf16.mxu0 %v2399_v30 }
 0x557   : > { %v1234_v36 = vmul.f32 %v2383_v34, %v2375_v6 }
 0x558   : > { %2253 = vmatmul.mubr.msk.bf16.vlgmr.msra.gmra.mrb[8].mxu0 %vm1190_vm8, %v1237_v35  ;;  %v2350_v35 = vld [vmem:[%s2579_s4 + $0x40] sm:$0xff]  }
 0x559   : > { %v1238_v37 = vpack.c.bf16 %v1234_v36, %v1234_v36  ;;  %2270 = vmatprep.mubr.msk.bf16.mxu0 %vm2400_vm2, %v2399_v30  ;;  %2263 = vmatpush3.bf16.msra.mxu0 %v2334_v38  ;;  %v2351_v36 = vld [vmem:[%s2579_s4] sm:$0xff]   ;;  %v2353_v38 = vld [vmem:[%s2579_s4 + $0x8] sm:$0xff]  }
 0x55a   : > { %2264 = vmatprep.subr.bf16.mxu0 %v2399_v30 }
 0x55b   : > { %2259 = vmatmul.mubr.msk.bf16.vlgmr.msra.gmra.mrb[20].mxu1 %vm1190_vm8, %v1238_v37  ;;  %v2352_v37 = vld [vmem:[%s2579_s4 + $0x48] sm:$0xff]  }
 0x55c   : > { %1650 = vmatprep.mubr.bf16.mxu1 %v2398_v12 }
 0x55d   : > { %2265 = vmatpush3.bf16.msra.mxu0 %v2335_v43  ;;  %v2358_v43 = vld [vmem:[%s2579_s4 + $0x60] sm:$0xff]  }
 0x55e   : > { %2266 = vmatprep.subr.bf16.mxu0 %v2399_v30 }
 0x561   : > { %2267 = vmatpush3.bf16.msra.mxu0 %v2336_v44  ;;  %v2359_v44 = vld [vmem:[%s2579_s4 + $0x20] sm:$0xff]  }
 0x562   : > { %2268 = vmatprep.subr.bf16.mxu0 %v2399_v30 }
 0x565   : > { %2269 = vmatpush3.bf16.msra.mxu0 %v2337_v45  ;;  %v2360_v45 = vld [vmem:[%s2579_s4 + $0x68] sm:$0xff]  }
 0x566   : > { %2192 = vmatprep.subr.bf16.mxu0 %v2350_v35 }
 0x5bf   : > { %v1280_v39 = vpop.f32.mrb[4].mxu0 }
 0x5c0   : > { %v2242_v40 = vpop.f32.mrb[5].mxu0 }
 0x5c1   : > { %v1283_v41 = vpop.f32.mrb[6].mxu0  ;;  %v2355_v40 = vld [vmem:[%s2579_s4 + $0x10] sm:$0xff]  }
 0x5c2   : > { %v2243_v42 = vpop.f32.mrb[7].mxu0  ;;  %v2356_v41 = vld [vmem:[%s2579_s4 + $0x58] sm:$0xff]  }
 0x5c3   : > { %v2357_v42 = vld [vmem:[%s2579_s4 + $0x18] sm:$0xff]  }
 0x626   : > { %v1326_v47 = vpop.f32.mrb[16].mxu1 }
 0x627   : > { %1425 = vrot.lane.b32.xlu1 %v1326_v47, %s2405_s25  ;;  %v2248_v12 = vpop.f32.mrb[17].mxu1  ;;  %v2361_v47 = vld [vmem:[%s2579_s4 + $0x28] sm:$0xff]  }
 0x628   : > { %v1329_v48 = vpop.f32.mrb[18].mxu1  ;;  %v2362_v12 = vld [vmem:[%s2579_s4 + $0x70] sm:$0xff]  }
 0x629   : > { %v2249_v49 = vpop.f32.mrb[19].mxu1  ;;  %v2363_v48 = vld [vmem:[%s2579_s4 + $0x30] sm:$0xff]  }
 0x62a   : > { %v2364_v49 = vld [vmem:[%s2579_s4 + $0x78] sm:$0xff]  }
 0x62b   : > { %v1372_v50 = vpop.f32.mrb[8].mxu0 }
 0x62c   : > { %1429 = vrot.lane.b32.xlu0 %v1372_v50, %s2406_s6  ;;  %v2254_v51 = vpop.f32.mrb[9].mxu0  ;;  %v2365_v50 = vld [vmem:[%s2579_s4 + $0x38] sm:$0xff]  }
 0x62d   : > { %v1375_v52 = vpop.f32.mrb[10].mxu0  ;;  %v1563_v51 = vld [vmem:[%s2569_s21] sm:$0x3] }
 0x62e   : > { %v2255_v53 = vpop.f32.mrb[11].mxu0  ;;  %v1418_v54 = vpop.f32.mrb[20].mxu1  ;;  %v1568_v52 = vrot.slane %v1563_v51, %v824_v29 }
 0x62f   : > { %1433 = vrot.lane.b32.xlu1 %v1418_v54, %s2407_s22  ;;  %v2260_v55 = vpop.f32.mrb[21].mxu1  ;;  %v1572_v53 = vrot.slane %v1563_v51, %v828_v32 }
 0x630   : > { %v1421_v30 = vpop.f32.mrb[22].mxu1 }
 0x631   : > { %v2261_v56 = vpop.f32.mrb[23].mxu1 }
 0x699   : > { %v1426_v57 = vpop.permute.xlu1 %1425 }
 0x69a   : > { %v1436_v59 = vsel %vm995_vm5, %v1280_v39, %v1426_v57  ;;  %v2354_v39 = vld [vmem:[%s2579_s4 + $0x50] sm:$0xff]  }
 0x69e   : > { %v1430_v58 = vpop.permute.xlu0 %1429 }
 0x69f   : > { %v1438_v60 = vsel %vm1437_vm9, %v1436_v59, %v1430_v58 }
 0x6a1   : > { %v1434_v61 = vpop.permute.xlu1 %1433 }
 0x6a2   : > { %v1440_v62 = vsel %vm1439_vm10, %v1438_v60, %v1434_v61 }
 0x6a3   : > { %v1441_v63 = vpack.c.bf16 %v1440_v62, %v1440_v62 }
 0x6a5   : > { %2271 = vmatmul.mubr.msk.bf16.vlgmr.msra.gmra.mrb[12].mxu0 %vm780_vm1, %v1441_v63 }
 0x6a6   : > { %2193 = vmatpush3.bf16.msra.mxu0 %v2351_v36 }
 0x6a7   : > { %2194 = vmatprep.subr.bf16.mxu0 %v2352_v37 }
 0x6aa   : > { %2195 = vmatpush3.bf16.msra.mxu0 %v2353_v38 }
 0x6ab   : > { %2196 = vmatprep.subr.bf16.mxu0 %v2354_v39 }
 0x6ae   : > { %2197 = vmatpush3.bf16.msra.mxu0 %v2355_v40 }
 0x6af   : > { %2198 = vmatprep.subr.bf16.mxu0 %v2356_v41 }
 0x6b2   : > { %2199 = vmatpush3.bf16.msra.mxu0 %v2357_v42 }
 0x6b3   : > { %2200 = vmatprep.subr.bf16.mxu0 %v2358_v43 }
 0x6b6   : > { %2201 = vmatpush3.bf16.msra.mxu0 %v2359_v44 }
 0x6b7   : > { %2202 = vmatprep.subr.bf16.mxu0 %v2360_v45 }
 0x6ba   : > { %2203 = vmatpush3.bf16.msra.mxu0 %v2361_v47 }
 0x6bb   : > { %2204 = vmatprep.subr.bf16.mxu0 %v2362_v12 }
 0x6be   : > { %2205 = vmatpush3.bf16.msra.mxu0 %v2363_v48 }
 0x6bf   : > { %2206 = vmatprep.subr.bf16.mxu0 %v2364_v49 }
 0x6c2   : > { %2207 = vmatpush3.bf16.msra.mxu0 %v2365_v50 }
 0x778   : > { %v1518_v2 = vpop.f32.mrb[12].mxu0 }
 0x779   : > { %v1519_v3 = vadd.f32 %v2129_v0, %v1518_v2  ;;  %v2272_v4 = vpop.f32.mrb[13].mxu0 }
 0x77a   : > { %v1521_v5 = vpop.f32.mrb[14].mxu0 }
 0x77b   : > { %v2733_v6 = vadd.f32 %v1519_v3, %v2602_v1  ;;  %v2273_v7 = vpop.f32.mrb[15].mxu0  ;;  %v2338_v1 = vld [vmem:[%s2564_s3] ss:$8 sps:$4 sm:$0xff]  }
 0x77c   : > { %1619 = vmatpush1.bf16.msra.mxu1 %v2338_v1  ;;  %v2146_v1 = vld [vmem:[%s2846_s0] ss:$0 sm:$0xff] }
 0x77d   : > { %v1525_v8 = vsel %vm780_vm1, %v2733_v6, 0.0  ;;  %1620 = vmatprep.subr.bf16.mxu1 %v2343_v16 }
 0x77e   : > { %1526 = vadd.xlane.f32.xlu0 %v1525_v8 }
 0x780   : > { %1621 = vmatpush1.bf16.msra.mxu1 %v2341_v17 }
 0x781   : > { %1622 = vmatprep.subr.bf16.mxu1 %v2346_v18 }
 0x784   : > { %1623 = vmatpush1.bf16.msra.mxu1 %v2344_v46 }
 0x785   : > { %1624 = vmatprep.subr.bf16.mxu1 %v2349_v20 }
 0x788   : > { %1625 = vmatpush1.bf16.msra.mxu1 %v2347_v19 }
 0x80b   : > { %v1527_v9 = vpop.xlane.xlu0 %1526 }
 0x80c   : > { %v1528_v10 = vmul.f32 0.015625, %v1527_v9 }
 0x80e   : > { %v1529_v11 = vsub.f32 %v2733_v6, %v1528_v10 }
 0x810   : > { %v1530_v13 = vmul.f32 %v1529_v11, %v1529_v11 }
 0x812   : > { %v1531_v14 = vsel %vm780_vm1, %v1530_v13, 0.0 }
 0x813   : > { %1532 = vadd.xlane.f32.xlu1 %v1531_v14 }
 0x8a0   : > { %v1533_v21 = vpop.xlane.xlu1 %1532 }
 0x8a1   : > { %v1534_v22 = vmul.f32 0.015625, %v1533_v21 }
 0x8a3   : > { %v1535_v23 = vadd.f32 1e-05, %v1534_v22 }
 0x8a5   : > { %2384 = vrsqrt.f32 %v1535_v23 }
 0x8af   : > { %v2385_v24 = vpop.eup %2384 }
 0x8b0   : > { %v1537_v26 = vmul.f32 %v2385_v24, %v1529_v11 }
 0x8b2   : > { %v1545_v27 = vmul.f32 %v2135_v25, %v1537_v26 }
 0x8b4   : > { %v1553_v33 = vadd.f32 %v2136_v31, %v1545_v27 }
 0x8b6   : > { %v1554_v34 = vpack.c.bf16 %v1553_v33, %v1553_v33 }
 0x8b8   : > { %2145 = vmatmul.mubr.msk.bf16.vlgmr.msra.gmra.mrb[24].mxu1 %vm780_vm1, %v1554_v34 }
 0x98b   : > { %v1652_v54 = vpop.f32.mrb[24].mxu1 }
 0x98c   : > { %v1653_v55 = vadd.f32 %v1652_v54, %v1568_v52  ;;  %v1654_v30 = vpop.f32.mrb[25].mxu1 }
 0x98d   : > { %v1655_v56 = vadd.f32 %v1654_v30, %v1572_v53  ;;  %v1656_v57 = vpop.f32.mrb[26].mxu1 }
 0x98e   : > { %v1661_v58 = vmul.f32 0.044715, %v1653_v55  ;;  %v1657_v59 = vpop.f32.mrb[27].mxu1  ;;  %v1659_v32 = vmul.f32 0.5, %v1653_v55 }
 0x98f   : > { %v1662_v60 = vmul.f32 0.044715, %v1655_v56  ;;  %v1660_v8 = vmul.f32 0.5, %v1655_v56 }
 0x990   : > { %v1663_v61 = vmul.f32 %v1661_v58, %v1653_v55 }
 0x991   : > { %v1664_v62 = vmul.f32 %v1662_v60, %v1655_v56 }
 0x992   : > { %v1665_v63 = vmul.f32 %v1663_v61, %v1653_v55 }
 0x993   : > { %v1666_v0 = vmul.f32 %v1664_v62, %v1655_v56 }
 0x994   : > { %v1667_v2 = vadd.f32 %v1665_v63, %v1653_v55 }
 0x995   : > { %v1668_v3 = vadd.f32 %v1666_v0, %v1655_v56 }
 0x996   : > { %v1669_v4 = vmul.f32 0.7978846, %v1667_v2 }
 0x997   : > { %v1670_v5 = vmul.f32 0.7978846, %v1668_v3 }
 0x998   : > { %2386 = vtanh.f32 %v1669_v4 }
 0x999   : > { %2388 = vtanh.f32 %v1670_v5 }
 0x9a2   : > { %v2387_v28 = vpop.eup %2386 }
 0x9a3   : > { %v2389_v29 = vpop.eup %2388  ;;  %v1673_v7 = vadd.f32 1.0, %v2387_v28 }
 0x9a4   : > { %v1674_v9 = vadd.f32 1.0, %v2389_v29 }
 0x9a5   : > { %v1675_v10 = vmul.f32 %v1673_v7, %v1659_v32 }
 0x9a6   : > { %v1676_v11 = vmul.f32 %v1674_v9, %v1660_v8 }
 0x9a7   : > { %v1677_v14 = vpack.c.bf16 %v1675_v10, %v1675_v10 }
 0x9a8   : > { %v1678_v13 = vpack.c.bf16 %v1676_v11, %v1676_v11 }
 0x9aa   : > { %1846 = vmatprep.mubr.bf16.mxu0 %v1678_v13 }
 0x9ab   : > { %1847 = vmatmul.mubr.bf16.vlgmr.msra.gmra.mrb[16].mxu0 %v1677_v14 }
 0xa7e   : > { %v2208_v15 = vpop.f32.mrb[16].mxu0 }
 0xa7f   : > { %v2209_v16 = vpop.f32.mrb[17].mxu0 }
 0xa80   : > { %v2210_v17 = vadd.f32 %v2209_v16, %v2208_v15  ;;  %v2211_v18 = vpop.f32.mrb[18].mxu0 }
 0xa81   : > { %v2212_v46 = vpop.f32.mrb[19].mxu0 }
 0xa82   : > { %v1849_v19 = vadd.f32 %v2210_v17, %v2146_v1 }
 0xa84   : > { %v1854_v20 = vadd.f32 %v1849_v19, %v2733_v6 }
 0xa86   : > { %1855 = vst.msk [vmem:[%s2836_s7] sm:$0xff] %vm780_vm1, %v1854_v20 }
 0xa87 PF: > { %s2847_s28 = sld [smem:[#allocation2_spill]] }
 0xa8d   : > { %s28_s24 = sadd.s32 1, %s2847_s28  }
 0xa8e   : > { %p25_p5 = scmp.ge.s32.totalorder %s28_s24, 4  }
 0xa90   :  { %27 = sbr.rel (!%p25_p5) target bundleno = 10 (0xa), region = 173 }

// kernel: _lambda_.3
= control target key start
LH: loop header
LB: loop body
LE: loop exit
PB: predicated region body
PF: predicated region fallthrough
CT: control target
= control target key end

     0   :  { %9 = vsyncpa [#allocation5], 0  ;;  %s2651_s15 = smov 0   ;;  %s3264_s0 = inlined_call_operand.vmem [shape: f32[1,64], index: 0, kind: input, shape index: {}]   ;;  %s3265_s1 = inlined_call_operand.vmem [shape: f32[1,64], index: 1, kind: input, shape index: {}]   ;;  %s3266_s2 = inlined_call_operand.vmem [shape: f32[1,64], index: 2, kind: input, shape index: {}]   ;;  %s3267_s3 = inlined_call_operand.vmem [shape: bf16[51200,64], index: 3, kind: input, shape index: {}]   ;;  %s3268_s4 = inlined_call_operand.hbm [shape: s32[1,1], index: 4, kind: output, shape index: {}]  }
   0x1 LB: > { %s2657_s16 = sadd.s32 4294967295, %s2621_s15   ;;  %p2085_p0 = scmp.ge.s32.totalorder %s2621_s15, 1  ;;  %s2621_s15 = sphi %s2651_s15, %s15_s15  }
   0x2   : > { %p159_p1 = scmp.lt.s32.totalorder %s2621_s15, 26 }
   0x4   : > { %p160_p2 = pnand %p2085_p0, %p159_p1 }
   0x5   : > { %s2086_s17 = sshll.u32 (!%p160_p2), %s2657_s16, 8  ;;  %p2088_p4 = scmp.ne.s32.totalorder (!%p160_p2), %s2657_s16, 0 }
   0x6   : > { %163 = sbr.rel (%p160_p2) target bundleno = 1296 (0x510), region = 36  ;;  %p181_p3 = scmp.lt.s32.totalorder (!%p160_p2), %s2086_s17, 6399 }
   0xd   : > { %s3289_s17 = smov (!%p181_p3, %s2086_s17), 6399  ;;  %190 = sbr.rel (%p2088_p4) target bundleno = 332 (0x14c), region = 40 }
   0xe   : > { %s2087_s18 = sshll.u32 %s3289_s17, 2  ;;  %v191_v0 = vld [vmem:[%s3264_s0] sm:$0x1] (!%p2088_p4)  ;;  %vm192_vm0 = vcmask (!%p2088_p4), 516096   ;;  %vm218_vm1 = vcmask (!%p2088_p4), 0   ;;  %v2623_v7 = vmov (!%p2088_p4), -inf  }
   0xf   : > { %s2665_s21 = scalar_lea.vmem %s3267_s3, %s2087_s18  ;;  %v193_v1 = vsel (!%p2088_p4), %vm192_vm0, %v191_v0, 0.0  ;;  %219 = vst.msk [vmem:[#allocation2] sm:$0x1] (!%p2088_p4), %vm218_vm1, %v2623_v7  ;;  %v2624_v8 = vmov (!%p2088_p4), 0   ;;  %v207_v13 = vld [vmem:[%s3265_s1] sm:$0x1] (!%p2088_p4) }
  0x10   : > { %194 = vadd.xlane.f32.xlu0 (!%p2088_p4), %v193_v1  ;;  %220 = vst.msk [vmem:[#allocation4] sm:$0x1] (!%p2088_p4), %vm218_vm1, %v2624_v8  ;;  %v209_v15 = vld [vmem:[%s3266_s2] sm:$0x1] (!%p2088_p4)  ;;  %vm213_vm2 = vsmask.f32 (!%p2088_p4), 256 }
  0x11   : > { %vm214_vm3 = vmand (!%p2088_p4), %vm192_vm0, %vm213_vm2  ;;  %v215_v18 = vld [vmem:[#allocation3] sm:$0x1] (!%p2088_p4) }
  0x9d   : > { %v195_v2 = vpop.xlane.xlu0 %194 }
  0x9e   : > { %v197_v3 = vmul.f32 0.015625, %v195_v2 }
  0xa0   : > { %v198_v4 = vsub.f32 %v191_v0, %v197_v3 }
  0xa2   : > { %v199_v5 = vmul.f32 %v198_v4, %v198_v4 }
  0xa4   : > { %v200_v6 = vsel %vm192_vm0, %v199_v5, 0.0 }
  0xa5   : > { %201 = vadd.xlane.f32.xlu0 %v200_v6 }
 0x132   : > { %v202_v9 = vpop.xlane.xlu0 %201 }
 0x133   : > { %v203_v10 = vmul.f32 0.015625, %v202_v9 }
 0x135   : > { %v204_v11 = vadd.f32 1e-05, %v203_v10 }
 0x137   : > { %2455 = vrsqrt.f32 %v204_v11 }
 0x141   : > { %v2456_v12 = vpop.eup %2455 }
 0x142   : > { %v206_v14 = vmul.f32 %v2456_v12, %v198_v4 }
 0x144   : > { %v208_v16 = vmul.f32 %v207_v13, %v206_v14 }
 0x146   : > { %v210_v17 = vadd.f32 %v209_v15, %v208_v16 }
 0x148   : > { %v211_v19 = vpack.c.bf16 %v210_v17, %v210_v17 }
 0x14a   : > { %v216_v20 = vsel %vm214_vm3, %v211_v19, %v215_v18 }
 0x14b   : > { %217 = vst [vmem:[#allocation3] sm:$0x1] %v216_v20 }
 0x14c PF: > { %v2457_v21 = vld [vmem:[%s2665_s21 + $0x40] sm:$0xff]   ;;  %vm1118_vm4 = vcmask 523264   ;;  %v2461_v26 = vld [vmem:[%s2665_s21 + $0x48] sm:$0xff]   ;;  %v2465_v32 = vld [vmem:[%s2665_s21 + $0x50] sm:$0xff]   ;;  %s2225_s28 = sshll.u32 %s2657_s16, 11  ;;  %vm3269_vm7 = vcmask 1040384  }
 0x14d   : > { %v2458_v22 = vld [vmem:[%s2665_s21 + $0xc0] sm:$0xff]   ;;  %2374 = vmatprep.subr.msk.bf16.mxu0 %vm1118_vm4, %v2457_v21  ;;  %v2462_v28 = vld [vmem:[%s2665_s21 + $0xc8] sm:$0xff]   ;;  %v2466_v34 = vld [vmem:[%s2665_s21 + $0xd0] sm:$0xff]   ;;  %s2625_s29 = smov [#allocation4]   ;;  %p2442_p5 = scmp.eq.s32.totalorder %s2657_s16, 24 }
 0x14e   : > { %v2459_v23 = vld [vmem:[%s2665_s21] sm:$0xff]   ;;  %2382 = vmatprep.subr.msk.bf16.mxu1 %vm1118_vm4, %v2458_v22  ;;  %v2463_v29 = vld [vmem:[%s2665_s21 + $0x8] sm:$0xff]   ;;  %v2467_v35 = vld [vmem:[%s2665_s21 + $0x10] sm:$0xff]   ;;  %s2043_s30 = sshll.u32 %s2625_s29, 4  ;;  %s2044_s30 = int_to_ptr.vmem [resolvable:$true] %s2043_s30 }
 0x14f   : > { %v2460_v24 = vld [vmem:[%s2665_s21 + $0x80] sm:$0xff]   ;;  %v1123_v25 = vsel %vm1118_vm4, %v2459_v23, 0  ;;  %v2464_v30 = vld [vmem:[%s2665_s21 + $0x88] sm:$0xff]   ;;  %v1126_v31 = vsel %vm1118_vm4, %v2463_v29, 0  ;;  %v2468_v36 = vld [vmem:[%s2665_s21 + $0x90] sm:$0xff]   ;;  %v1129_v37 = vsel %vm1118_vm4, %v2467_v35, 0  ;;  %p2592_p9 = scmp.lt.s32.totalorder %s2044_s30, %s2044_s30 }
 0x150   : > { %2231 = vmatpush3.bf16.xpose.msra.mxu0 %v1123_v25  ;;  %v1171_v27 = vsel %vm1118_vm4, %v2460_v24, 0  ;;  %v1174_v33 = vsel %vm1118_vm4, %v2464_v30, 0  ;;  %v2469_v38 = vld [vmem:[%s2665_s21 + $0x58] sm:$0xff]   ;;  %v1177_v39 = vsel %vm1118_vm4, %v2468_v36, 0  ;;  %v2473_v44 = vld [vmem:[%s2665_s21 + $0x60] sm:$0xff]   ;;  %v2477_v51 = vld [vmem:[%s2665_s21 + $0x68] sm:$0xff]  }
 0x151   : > { %2249 = vmatpush3.bf16.xpose.msra.mxu1 %v1171_v27  ;;  %2375 = vmatprep.subr.msk.bf16.mxu0 %vm1118_vm4, %v2461_v26  ;;  %v2470_v40 = vld [vmem:[%s2665_s21 + $0xd8] sm:$0xff]   ;;  %v2474_v46 = vld [vmem:[%s2665_s21 + $0xe0] sm:$0xff]   ;;  %v2478_v53 = vld [vmem:[%s2665_s21 + $0xe8] sm:$0xff]   ;;  %s2585_s5 = scalar_lea.vmem %s2044_s30, 16  ;;  %s2591_s6 = scalar_lea.vmem %s2044_s30, 32 }
 0x152   : > { %2383 = vmatprep.subr.msk.bf16.mxu1 %vm1118_vm4, %v2462_v28  ;;  %v2471_v41 = vld [vmem:[%s2665_s21 + $0x18] sm:$0xff]   ;;  %v2475_v47 = vld [vmem:[%s2665_s21 + $0x20] sm:$0xff]   ;;  %v2479_v54 = vld [vmem:[%s2665_s21 + $0x28] sm:$0xff]   ;;  %p2586_p6 = scmp.ne.s32.totalorder %s2044_s30, %s2585_s5  ;;  %p2593_p10 = scmp.lt.s32.totalorder %s2591_s6, %s2585_s5 }
 0x153   : > { %v2472_v42 = vld [vmem:[%s2665_s21 + $0x98] sm:$0xff]   ;;  %v1132_v43 = vsel %vm1118_vm4, %v2471_v41, 0  ;;  %v2476_v48 = vld [vmem:[%s2665_s21 + $0xa0] sm:$0xff]   ;;  %v1135_v50 = vsel %vm1118_vm4, %v2475_v47, 0  ;;  %v2480_v55 = vld [vmem:[%s2665_s21 + $0xa8] sm:$0xff]   ;;  %v1138_v56 = vsel %vm1118_vm4, %v2479_v54, 0 }
 0x154   : > { %v1180_v45 = vsel %vm1118_vm4, %v2472_v42, 0  ;;  %v2718_v49 = vld [vmem:[#allocation3] sm:$0x1]  ;;  %v1183_v52 = vsel %vm1118_vm4, %v2476_v48, 0  ;;  %v2481_v57 = vld [vmem:[%s2665_s21 + $0x70] sm:$0xff]   ;;  %v1186_v58 = vsel %vm1118_vm4, %v2480_v55, 0  ;;  %p2587_p7 = pnand %p2586_p6, %p2442_p5  ;;  %p2594_p11 = por %p2593_p10, %p2592_p9 }
 0x155   : > { %2246 = vmatprep.mubr.msk.bf16.mxu0 %vm1118_vm4, %v2718_v49  ;;  %2264 = vmatprep.mubr.msk.bf16.mxu1 %vm1118_vm4, %v2718_v49  ;;  %v2482_v59 = vld [vmem:[%s2665_s21 + $0xf0] sm:$0xff]   ;;  %v2485_v63 = vld [vmem:[%s2665_s21 + $0x78] sm:$0xff]   ;;  %v2489_v5 = vld [vmem:[%s2665_s21 + $0x140] sm:$0xff]  }
 0x156   : > { %v2483_v60 = vld [vmem:[%s2665_s21 + $0x30] sm:$0xff]   ;;  %v2486_v1 = vld [vmem:[%s2665_s21 + $0xf8] sm:$0xff]   ;;  %v2490_v7 = vld [vmem:[%s2665_s21 + $0x1c0] sm:$0xff]   ;;  %p2588_p8 = pneg %p2587_p7 }
 0x157   : > { %v2484_v61 = vld [vmem:[%s2665_s21 + $0xb0] sm:$0xff]   ;;  %v1141_v62 = vsel %vm1118_vm4, %v2483_v60, 0  ;;  %v2487_v2 = vld [vmem:[%s2665_s21 + $0x38] sm:$0xff]   ;;  %v2491_v8 = vld [vmem:[%s2665_s21 + $0x100] sm:$0xff]  }
 0x158   : > { %2233 = vmatpush3.bf16.xpose.msra.mxu0 %v1126_v31  ;;  %v1189_v0 = vsel %vm1118_vm4, %v2484_v61, 0  ;;  %v2488_v3 = vld [vmem:[%s2665_s21 + $0xb8] sm:$0xff]   ;;  %v1144_v4 = vsel %vm1118_vm4, %v2487_v2, 0  ;;  %v2492_v9 = vld [vmem:[%s2665_s21 + $0x180] sm:$0xff]   ;;  %v1219_v10 = vsel %vm1118_vm4, %v2491_v8, 0  ;;  %v2493_v11 = vld [vmem:[%s2665_s21 + $0x148] sm:$0xff]   ;;  %p2595_p12 = pnand %p2594_p11, %p2588_p8 }
 0x159   : > { %2251 = vmatpush3.bf16.xpose.msra.mxu1 %v1174_v33  ;;  %2376 = vmatprep.subr.msk.bf16.mxu0 %vm1118_vm4, %v2465_v32  ;;  %v1192_v6 = vsel %vm1118_vm4, %v2488_v3, 0  ;;  %v1267_v12 = vsel %vm1118_vm4, %v2492_v9, 0  ;;  %v2494_v13 = vld [vmem:[%s2665_s21 + $0x1c8] sm:$0xff]   ;;  %v2497_v17 = vld [vmem:[%s2665_s21 + $0x150] sm:$0xff]   ;;  %v2501_v23 = vld [vmem:[%s2665_s21 + $0x158] sm:$0xff]  }
 0x15a   : > { %2384 = vmatprep.subr.msk.bf16.mxu1 %vm1118_vm4, %v2466_v34  ;;  %v2495_v14 = vld [vmem:[%s2665_s21 + $0x108] sm:$0xff]   ;;  %v2498_v19 = vld [vmem:[%s2665_s21 + $0x1d0] sm:$0xff]   ;;  %v2502_v25 = vld [vmem:[%s2665_s21 + $0x1d8] sm:$0xff]  }
 0x15b   : > { %v2496_v15 = vld [vmem:[%s2665_s21 + $0x188] sm:$0xff]   ;;  %v1222_v16 = vsel %vm1118_vm4, %v2495_v14, 0  ;;  %v2499_v20 = vld [vmem:[%s2665_s21 + $0x110] sm:$0xff]   ;;  %v2503_v26 = vld [vmem:[%s2665_s21 + $0x118] sm:$0xff]  }
 0x15c   : > { %v1270_v18 = vsel %vm1118_vm4, %v2496_v15, 0  ;;  %v2500_v21 = vld [vmem:[%s2665_s21 + $0x190] sm:$0xff]   ;;  %v1225_v22 = vsel %vm1118_vm4, %v2499_v20, 0  ;;  %v2504_v27 = vld [vmem:[%s2665_s21 + $0x198] sm:$0xff]   ;;  %v1228_v28 = vsel %vm1118_vm4, %v2503_v26, 0  ;;  %v2505_v29 = vld [vmem:[%s2665_s21 + $0x160] sm:$0xff]  }
 0x15d   : > { %v1273_v24 = vsel %vm1118_vm4, %v2500_v21, 0  ;;  %v1276_v30 = vsel %vm1118_vm4, %v2504_v27, 0  ;;  %v2506_v31 = vld [vmem:[%s2665_s21 + $0x1e0] sm:$0xff]   ;;  %v2509_v35 = vld [vmem:[%s2665_s21 + $0x168] sm:$0xff]   ;;  %v2513_v41 = vld [vmem:[%s2665_s21 + $0x170] sm:$0xff]  }
 0x15e   : > { %v2507_v32 = vld [vmem:[%s2665_s21 + $0x120] sm:$0xff]   ;;  %v2517_v47 = vld [vmem:[%s2665_s21 + $0x178] sm:$0xff]   ;;  %v2525_v60 = vld [vmem:[%s2665_s21 + $0x248] sm:$0xff]  }
 0x15f   : > { %v2508_v33 = vld [vmem:[%s2665_s21 + $0x1a0] sm:$0xff]   ;;  %v1231_v34 = vsel %vm1118_vm4, %v2507_v32, 0  ;;  %v2529_v2 = vld [vmem:[%s2665_s21 + $0x250] sm:$0xff]   ;;  %v2533_v8 = vld [vmem:[%s2665_s21 + $0x258] sm:$0xff]  }
 0x160   : > { %2235 = vmatpush3.bf16.xpose.msra.mxu0 %v1129_v37  ;;  %v1279_v36 = vsel %vm1118_vm4, %v2508_v33, 0  ;;  %v2510_v37 = vld [vmem:[%s2665_s21 + $0x1e8] sm:$0xff]   ;;  %v2521_v54 = vld [vmem:[%s2665_s21 + $0x240] sm:$0xff]   ;;  %v2545_v26 = vld [vmem:[%s2665_s21 + $0x270] sm:$0xff]  }
 0x161   : > { %2253 = vmatpush3.bf16.xpose.msra.mxu1 %v1177_v39  ;;  %2377 = vmatprep.subr.msk.bf16.mxu0 %vm1118_vm4, %v2469_v38  ;;  %v2511_v38 = vld [vmem:[%s2665_s21 + $0x128] sm:$0xff]   ;;  %v2537_v14 = vld [vmem:[%s2665_s21 + $0x260] sm:$0xff]   ;;  %v2549_v32 = vld [vmem:[%s2665_s21 + $0x278] sm:$0xff]  }
 0x162   : > { %2385 = vmatprep.subr.msk.bf16.mxu1 %vm1118_vm4, %v2470_v40  ;;  %v2512_v39 = vld [vmem:[%s2665_s21 + $0x1a8] sm:$0xff]   ;;  %v1234_v40 = vsel %vm1118_vm4, %v2511_v38, 0  ;;  %v2553_v38 = vld [vmem:[%s2665_s21 + $0x340] sm:$0xff]  }
 0x163   : > { %v1282_v42 = vsel %vm1118_vm4, %v2512_v39, 0  ;;  %v2541_v20 = vld [vmem:[%s2665_s21 + $0x268] sm:$0xff]  }
 0x168   : > { %2237 = vmatpush3.bf16.xpose.msra.mxu0 %v1132_v43  ;;  %v2514_v43 = vld [vmem:[%s2665_s21 + $0x1f0] sm:$0xff]  }
 0x169   : > { %2255 = vmatpush3.bf16.xpose.msra.mxu1 %v1180_v45  ;;  %2378 = vmatprep.subr.msk.bf16.mxu0 %vm1118_vm4, %v2473_v44  ;;  %v2515_v44 = vld [vmem:[%s2665_s21 + $0x130] sm:$0xff]  }
 0x16a   : > { %2386 = vmatprep.subr.msk.bf16.mxu1 %vm1118_vm4, %v2474_v46  ;;  %v2516_v45 = vld [vmem:[%s2665_s21 + $0x1b0] sm:$0xff]   ;;  %v1237_v46 = vsel %vm1118_vm4, %v2515_v44, 0  ;;  %v2557_v44 = vld [vmem:[%s2665_s21 + $0x348] sm:$0xff]  }
 0x16b   : > { %v1285_v48 = vsel %vm1118_vm4, %v2516_v45, 0 }
 0x170   : > { %2239 = vmatpush3.bf16.xpose.msra.mxu0 %v1135_v50  ;;  %v2518_v50 = vld [vmem:[%s2665_s21 + $0x1f8] sm:$0xff]  }
 0x171   : > { %2257 = vmatpush3.bf16.xpose.msra.mxu1 %v1183_v52  ;;  %2379 = vmatprep.subr.msk.bf16.mxu0 %vm1118_vm4, %v2477_v51  ;;  %v2519_v51 = vld [vmem:[%s2665_s21 + $0x138] sm:$0xff]  }
 0x172   : > { %2387 = vmatprep.subr.msk.bf16.mxu1 %vm1118_vm4, %v2478_v53  ;;  %v2520_v52 = vld [vmem:[%s2665_s21 + $0x1b8] sm:$0xff]   ;;  %v1240_v53 = vsel %vm1118_vm4, %v2519_v51, 0  ;;  %v2561_v51 = vld [vmem:[%s2665_s21 + $0x350] sm:$0xff]  }
 0x173   : > { %v1288_v55 = vsel %vm1118_vm4, %v2520_v52, 0 }
 0x178   : > { %2241 = vmatpush3.bf16.xpose.msra.mxu0 %v1138_v56  ;;  %v2522_v56 = vld [vmem:[%s2665_s21 + $0x2c0] sm:$0xff]  }
 0x179   : > { %2259 = vmatpush3.bf16.xpose.msra.mxu1 %v1186_v58  ;;  %2380 = vmatprep.subr.msk.bf16.mxu0 %vm1118_vm4, %v2481_v57  ;;  %v2523_v57 = vld [vmem:[%s2665_s21 + $0x200] sm:$0xff]  }
 0x17a   : > { %2388 = vmatprep.subr.msk.bf16.mxu1 %vm1118_vm4, %v2482_v59  ;;  %v2524_v58 = vld [vmem:[%s2665_s21 + $0x280] sm:$0xff]   ;;  %v1315_v59 = vsel %vm1118_vm4, %v2523_v57, 0  ;;  %v2565_v57 = vld [vmem:[%s2665_s21 + $0x358] sm:$0xff]  }
 0x17b   : > { %v1363_v61 = vsel %vm1118_vm4, %v2524_v58, 0 }
 0x180   : > { %2243 = vmatpush3.bf16.xpose.msra.mxu0 %v1141_v62  ;;  %v2526_v62 = vld [vmem:[%s2665_s21 + $0x2c8] sm:$0xff]  }
 0x181   : > { %2261 = vmatpush3.bf16.xpose.msra.mxu1 %v1189_v0  ;;  %2381 = vmatprep.subr.msk.bf16.mxu0 %vm1118_vm4, %v2485_v63  ;;  %v2527_v63 = vld [vmem:[%s2665_s21 + $0x208] sm:$0xff]  }
 0x182   : > { %2389 = vmatprep.subr.msk.bf16.mxu1 %vm1118_vm4, %v2486_v1  ;;  %v2528_v0 = vld [vmem:[%s2665_s21 + $0x288] sm:$0xff]   ;;  %v1318_v1 = vsel %vm1118_vm4, %v2527_v63, 0  ;;  %v2569_v63 = vld [vmem:[%s2665_s21 + $0x360] sm:$0xff]  }
 0x183   : > { %v1366_v3 = vsel %vm1118_vm4, %v2528_v0, 0 }
 0x188   : > { %2245 = vmatpush3.bf16.xpose.msra.mxu0 %v1144_v4  ;;  %v2530_v4 = vld [vmem:[%s2665_s21 + $0x2d0] sm:$0xff]  }
 0x189   : > { %2263 = vmatpush3.bf16.xpose.msra.mxu1 %v1192_v6  ;;  %2390 = vmatprep.subr.msk.bf16.mxu0 %vm1118_vm4, %v2489_v5  ;;  %v2531_v5 = vld [vmem:[%s2665_s21 + $0x210] sm:$0xff]  }
 0x18a   : > { %2398 = vmatprep.subr.msk.bf16.mxu1 %vm1118_vm4, %v2490_v7  ;;  %v2532_v6 = vld [vmem:[%s2665_s21 + $0x290] sm:$0xff]   ;;  %v1321_v7 = vsel %vm1118_vm4, %v2531_v5, 0  ;;  %v2573_v5 = vld [vmem:[%s2665_s21 + $0x368] sm:$0xff]  }
 0x18b   : > { %v1369_v9 = vsel %vm1118_vm4, %v2532_v6, 0 }
 0x18f   : > { %2247 = vmatmul.mubr.msk.bf16.vlgmr.msra.gmra.mrb[0].mxu0 %vm1118_vm4, %v2718_v49 }
 0x190   : > { %2265 = vmatmul.mubr.msk.bf16.vlgmr.msra.gmra.mrb[0].mxu1 %vm1118_vm4, %v2718_v49  ;;  %2267 = vmatpush3.bf16.xpose.msra.mxu0 %v1219_v10  ;;  %v2534_v10 = vld [vmem:[%s2665_s21 + $0x2d8] sm:$0xff]  }
 0x191   : > { %2285 = vmatpush3.bf16.xpose.msra.mxu1 %v1267_v12  ;;  %2391 = vmatprep.subr.msk.bf16.mxu0 %vm1118_vm4, %v2493_v11  ;;  %v2535_v11 = vld [vmem:[%s2665_s21 + $0x218] sm:$0xff]  }
 0x192   : > { %2399 = vmatprep.subr.msk.bf16.mxu1 %vm1118_vm4, %v2494_v13  ;;  %2282 = vmatprep.mubr.msk.bf16.mxu0 %vm1118_vm4, %v2718_v49  ;;  %v2536_v12 = vld [vmem:[%s2665_s21 + $0x298] sm:$0xff]   ;;  %v1324_v13 = vsel %vm1118_vm4, %v2535_v11, 0  ;;  %v2577_v11 = vld [vmem:[%s2665_s21 + $0x370] sm:$0xff]  }
 0x193   : > { %2300 = vmatprep.mubr.msk.bf16.mxu1 %vm1118_vm4, %v2718_v49  ;;  %v1372_v15 = vsel %vm1118_vm4, %v2536_v12, 0 }
 0x198   : > { %2269 = vmatpush3.bf16.xpose.msra.mxu0 %v1222_v16  ;;  %v2538_v16 = vld [vmem:[%s2665_s21 + $0x2e0] sm:$0xff]  }
 0x199   : > { %2287 = vmatpush3.bf16.xpose.msra.mxu1 %v1270_v18  ;;  %2392 = vmatprep.subr.msk.bf16.mxu0 %vm1118_vm4, %v2497_v17  ;;  %v2539_v17 = vld [vmem:[%s2665_s21 + $0x220] sm:$0xff]  }
 0x19a   : > { %2400 = vmatprep.subr.msk.bf16.mxu1 %vm1118_vm4, %v2498_v19  ;;  %v2540_v18 = vld [vmem:[%s2665_s21 + $0x2a0] sm:$0xff]   ;;  %v1327_v19 = vsel %vm1118_vm4, %v2539_v17, 0  ;;  %v2581_v17 = vld [vmem:[%s2665_s21 + $0x378] sm:$0xff]  }
 0x19b   : > { %v1375_v21 = vsel %vm1118_vm4, %v2540_v18, 0 }
 0x1a0   : > { %2271 = vmatpush3.bf16.xpose.msra.mxu0 %v1225_v22  ;;  %v2542_v22 = vld [vmem:[%s2665_s21 + $0x2e8] sm:$0xff]  }
 0x1a1   : > { %2289 = vmatpush3.bf16.xpose.msra.mxu1 %v1273_v24  ;;  %2393 = vmatprep.subr.msk.bf16.mxu0 %vm1118_vm4, %v2501_v23  ;;  %v2543_v23 = vld [vmem:[%s2665_s21 + $0x228] sm:$0xff]  }
 0x1a2   : > { %2401 = vmatprep.subr.msk.bf16.mxu1 %vm1118_vm4, %v2502_v25  ;;  %v2544_v24 = vld [vmem:[%s2665_s21 + $0x2a8] sm:$0xff]   ;;  %v1330_v25 = vsel %vm1118_vm4, %v2543_v23, 0 }
 0x1a3   : > { %v1378_v27 = vsel %vm1118_vm4, %v2544_v24, 0 }
 0x1a8   : > { %2273 = vmatpush3.bf16.xpose.msra.mxu0 %v1228_v28  ;;  %v2546_v28 = vld [vmem:[%s2665_s21 + $0x2f0] sm:$0xff]  }
 0x1a9   : > { %2291 = vmatpush3.bf16.xpose.msra.mxu1 %v1276_v30  ;;  %2394 = vmatprep.subr.msk.bf16.mxu0 %vm1118_vm4, %v2505_v29  ;;  %v2547_v29 = vld [vmem:[%s2665_s21 + $0x230] sm:$0xff]  }
 0x1aa   : > { %2402 = vmatprep.subr.msk.bf16.mxu1 %vm1118_vm4, %v2506_v31  ;;  %v2548_v30 = vld [vmem:[%s2665_s21 + $0x2b0] sm:$0xff]   ;;  %v1333_v31 = vsel %vm1118_vm4, %v2547_v29, 0 }
 0x1ab   : > { %v1381_v33 = vsel %vm1118_vm4, %v2548_v30, 0 }
 0x1b0   : > { %2275 = vmatpush3.bf16.xpose.msra.mxu0 %v1231_v34  ;;  %v2550_v34 = vld [vmem:[%s2665_s21 + $0x2f8] sm:$0xff]  }
 0x1b1   : > { %2293 = vmatpush3.bf16.xpose.msra.mxu1 %v1279_v36  ;;  %2395 = vmatprep.subr.msk.bf16.mxu0 %vm1118_vm4, %v2509_v35  ;;  %v2551_v35 = vld [vmem:[%s2665_s21 + $0x238] sm:$0xff]  }
 0x1b2   : > { %2403 = vmatprep.subr.msk.bf16.mxu1 %vm1118_vm4, %v2510_v37  ;;  %v2552_v36 = vld [vmem:[%s2665_s21 + $0x2b8] sm:$0xff]   ;;  %v1336_v37 = vsel %vm1118_vm4, %v2551_v35, 0 }
 0x1b3   : > { %v1384_v39 = vsel %vm1118_vm4, %v2552_v36, 0 }
 0x1b8   : > { %2277 = vmatpush3.bf16.xpose.msra.mxu0 %v1234_v40  ;;  %v2554_v40 = vld [vmem:[%s2665_s21 + $0x3c0] sm:$0xff]  }
 0x1b9   : > { %2295 = vmatpush3.bf16.xpose.msra.mxu1 %v1282_v42  ;;  %2396 = vmatprep.subr.msk.bf16.mxu0 %vm1118_vm4, %v2513_v41  ;;  %v2555_v41 = vld [vmem:[%s2665_s21 + $0x300] sm:$0xff]  }
 0x1ba   : > { %2404 = vmatprep.subr.msk.bf16.mxu1 %vm1118_vm4, %v2514_v43  ;;  %v2556_v42 = vld [vmem:[%s2665_s21 + $0x380] sm:$0xff]   ;;  %v1411_v43 = vsel %vm1118_vm4, %v2555_v41, 0 }
 0x1bb   : > { %v1459_v45 = vsel %vm1118_vm4, %v2556_v42, 0 }
 0x1c0   : > { %2279 = vmatpush3.bf16.xpose.msra.mxu0 %v1237_v46  ;;  %v2558_v46 = vld [vmem:[%s2665_s21 + $0x3c8] sm:$0xff]  }
 0x1c1   : > { %2297 = vmatpush3.bf16.xpose.msra.mxu1 %v1285_v48  ;;  %2397 = vmatprep.subr.msk.bf16.mxu0 %vm1118_vm4, %v2517_v47  ;;  %v2559_v47 = vld [vmem:[%s2665_s21 + $0x308] sm:$0xff]  }
 0x1c2   : > { %2405 = vmatprep.subr.msk.bf16.mxu1 %vm1118_vm4, %v2518_v50  ;;  %v2560_v48 = vld [vmem:[%s2665_s21 + $0x388] sm:$0xff]   ;;  %v1414_v50 = vsel %vm1118_vm4, %v2559_v47, 0  ;;  %v1835_v47 = vlaneseq }
 0x1c3   : > { %v1462_v52 = vsel %vm1118_vm4, %v2560_v48, 0 }
 0x1c4   : > { %v1836_v48 = vand.u32 127, %v1835_v47 }
 0x1c8   : > { %2281 = vmatpush3.bf16.xpose.msra.mxu0 %v1240_v53  ;;  %v2562_v53 = vld [vmem:[%s2665_s21 + $0x3d0] sm:$0xff]  }
 0x1c9   : > { %2299 = vmatpush3.bf16.xpose.msra.mxu1 %v1288_v55  ;;  %2406 = vmatprep.subr.msk.bf16.mxu0 %vm1118_vm4, %v2521_v54  ;;  %v2563_v54 = vld [vmem:[%s2665_s21 + $0x310] sm:$0xff]  }
 0x1ca   : > { %2414 = vmatprep.subr.msk.bf16.mxu1 %vm1118_vm4, %v2522_v56  ;;  %v2564_v55 = vld [vmem:[%s2665_s21 + $0x390] sm:$0xff]   ;;  %v1417_v56 = vsel %vm1118_vm4, %v2563_v54, 0 }
 0x1cb   : > { %v1465_v58 = vsel %vm1118_vm4, %v2564_v55, 0  ;;  %v1840_v55 = vadd.s32 512, %v1836_v48 }
 0x1cf   : > { %2283 = vmatmul.mubr.msk.bf16.vlgmr.msra.gmra.mrb[4].mxu0 %vm1118_vm4, %v2718_v49 }
 0x1d0   : > { %2301 = vmatmul.mubr.msk.bf16.vlgmr.msra.gmra.mrb[4].mxu1 %vm1118_vm4, %v2718_v49  ;;  %2303 = vmatpush3.bf16.xpose.msra.mxu0 %v1315_v59  ;;  %v2566_v59 = vld [vmem:[%s2665_s21 + $0x3d8] sm:$0xff]  }
 0x1d1   : > { %2321 = vmatpush3.bf16.xpose.msra.mxu1 %v1363_v61  ;;  %2407 = vmatprep.subr.msk.bf16.mxu0 %vm1118_vm4, %v2525_v60  ;;  %v2567_v60 = vld [vmem:[%s2665_s21 + $0x318] sm:$0xff]  }
 0x1d2   : > { %2415 = vmatprep.subr.msk.bf16.mxu1 %vm1118_vm4, %v2526_v62  ;;  %2318 = vmatprep.mubr.msk.bf16.mxu0 %vm1118_vm4, %v2718_v49  ;;  %v2568_v61 = vld [vmem:[%s2665_s21 + $0x398] sm:$0xff]   ;;  %v1420_v62 = vsel %vm1118_vm4, %v2567_v60, 0  ;;  %v1844_v60 = vadd.s32 1024, %v1836_v48 }
 0x1d3   : > { %2336 = vmatprep.mubr.msk.bf16.mxu1 %vm1118_vm4, %v2718_v49  ;;  %v1468_v0 = vsel %vm1118_vm4, %v2568_v61, 0 }
 0x1d8   : > { %2305 = vmatpush3.bf16.xpose.msra.mxu0 %v1318_v1  ;;  %v2570_v1 = vld [vmem:[%s2665_s21 + $0x3e0] sm:$0xff]  }
 0x1d9   : > { %2323 = vmatpush3.bf16.xpose.msra.mxu1 %v1366_v3  ;;  %2408 = vmatprep.subr.msk.bf16.mxu0 %vm1118_vm4, %v2529_v2  ;;  %v2571_v2 = vld [vmem:[%s2665_s21 + $0x320] sm:$0xff]  }
 0x1da   : > { %2416 = vmatprep.subr.msk.bf16.mxu1 %vm1118_vm4, %v2530_v4  ;;  %v2572_v3 = vld [vmem:[%s2665_s21 + $0x3a0] sm:$0xff]   ;;  %v1423_v4 = vsel %vm1118_vm4, %v2571_v2, 0 }
 0x1db   : > { %v1471_v6 = vsel %vm1118_vm4, %v2572_v3, 0 }
 0x1e0   : > { %2307 = vmatpush3.bf16.xpose.msra.mxu0 %v1321_v7  ;;  %v2574_v7 = vld [vmem:[%s2665_s21 + $0x3e8] sm:$0xff]  }
 0x1e1   : > { %2325 = vmatpush3.bf16.xpose.msra.mxu1 %v1369_v9  ;;  %2409 = vmatprep.subr.msk.bf16.mxu0 %vm1118_vm4, %v2533_v8  ;;  %v2575_v8 = vld [vmem:[%s2665_s21 + $0x328] sm:$0xff]  }
 0x1e2   : > { %2417 = vmatprep.subr.msk.bf16.mxu1 %vm1118_vm4, %v2534_v10  ;;  %v2576_v9 = vld [vmem:[%s2665_s21 + $0x3a8] sm:$0xff]   ;;  %v1426_v10 = vsel %vm1118_vm4, %v2575_v8, 0 }
 0x1e3   : > { %v1474_v12 = vsel %vm1118_vm4, %v2576_v9, 0 }
 0x1e8   : > { %2309 = vmatpush3.bf16.xpose.msra.mxu0 %v1324_v13  ;;  %v2578_v13 = vld [vmem:[%s2665_s21 + $0x3f0] sm:$0xff]  }
 0x1e9   : > { %2327 = vmatpush3.bf16.xpose.msra.mxu1 %v1372_v15  ;;  %2410 = vmatprep.subr.msk.bf16.mxu0 %vm1118_vm4, %v2537_v14  ;;  %v2579_v14 = vld [vmem:[%s2665_s21 + $0x330] sm:$0xff]  }
 0x1ea   : > { %2418 = vmatprep.subr.msk.bf16.mxu1 %vm1118_vm4, %v2538_v16  ;;  %v2580_v15 = vld [vmem:[%s2665_s21 + $0x3b0] sm:$0xff]   ;;  %v1429_v16 = vsel %vm1118_vm4, %v2579_v14, 0  ;;  %v1849_v14 = vadd.s32 1664, %v1836_v48 }
 0x1eb   : > { %v1477_v18 = vsel %vm1118_vm4, %v2580_v15, 0 }
 0x1f0   : > { %2311 = vmatpush3.bf16.xpose.msra.mxu0 %v1327_v19  ;;  %v2582_v19 = vld [vmem:[%s2665_s21 + $0x3f8] sm:$0xff]  }
 0x1f1   : > { %2329 = vmatpush3.bf16.xpose.msra.mxu1 %v1375_v21  ;;  %2411 = vmatprep.subr.msk.bf16.mxu0 %vm1118_vm4, %v2541_v20  ;;  %v2583_v20 = vld [vmem:[%s2665_s21 + $0x338] sm:$0xff]  }
 0x1f2   : > { %2419 = vmatprep.subr.msk.bf16.mxu1 %vm1118_vm4, %v2542_v22  ;;  %v2584_v21 = vld [vmem:[%s2665_s21 + $0x3b8] sm:$0xff]   ;;  %v1432_v22 = vsel %vm1118_vm4, %v2583_v20, 0 }
 0x1f3   : > { %v1480_v23 = vsel %vm1118_vm4, %v2584_v21, 0 }
 0x1f8   : > { %2313 = vmatpush3.bf16.xpose.msra.mxu0 %v1330_v25 }
 0x1f9   : > { %2331 = vmatpush3.bf16.xpose.msra.mxu1 %v1378_v27  ;;  %2412 = vmatprep.subr.msk.bf16.mxu0 %vm1118_vm4, %v2545_v26 }
 0x1fa   : > { %2420 = vmatprep.subr.msk.bf16.mxu1 %vm1118_vm4, %v2546_v28 }
 0x200   : > { %2315 = vmatpush3.bf16.xpose.msra.mxu0 %v1333_v31 }
 0x201   : > { %2333 = vmatpush3.bf16.xpose.msra.mxu1 %v1381_v33  ;;  %2413 = vmatprep.subr.msk.bf16.mxu0 %vm1118_vm4, %v2549_v32 }
 0x202   : > { %2421 = vmatprep.subr.msk.bf16.mxu1 %vm1118_vm4, %v2550_v34 }
 0x208   : > { %2317 = vmatpush3.bf16.xpose.msra.mxu0 %v1336_v37 }
 0x209   : > { %2335 = vmatpush3.bf16.xpose.msra.mxu1 %v1384_v39  ;;  %2422 = vmatprep.subr.msk.bf16.mxu0 %vm1118_vm4, %v2553_v38 }
 0x20a   : > { %2430 = vmatprep.subr.msk.bf16.mxu1 %vm1118_vm4, %v2554_v40 }
 0x20f   : > { %2319 = vmatmul.mubr.msk.bf16.vlgmr.msra.gmra.mrb[8].mxu0 %vm1118_vm4, %v2718_v49 }
 0x210   : > { %2337 = vmatmul.mubr.msk.bf16.vlgmr.msra.gmra.mrb[8].mxu1 %vm1118_vm4, %v2718_v49  ;;  %2339 = vmatpush3.bf16.xpose.msra.mxu0 %v1411_v43 }
 0x211   : > { %2357 = vmatpush3.bf16.xpose.msra.mxu1 %v1459_v45  ;;  %2423 = vmatprep.subr.msk.bf16.mxu0 %vm1118_vm4, %v2557_v44 }
 0x212   : > { %2431 = vmatprep.subr.msk.bf16.mxu1 %vm1118_vm4, %v2558_v46  ;;  %2354 = vmatprep.mubr.msk.bf16.mxu0 %vm1118_vm4, %v2718_v49 }
 0x213   : > { %2372 = vmatprep.mubr.msk.bf16.mxu1 %vm1118_vm4, %v2718_v49 }
 0x218   : > { %2341 = vmatpush3.bf16.xpose.msra.mxu0 %v1414_v50  ;;  %v1852_v50 = vstv %s2225_s28 }
 0x219   : > { %2359 = vmatpush3.bf16.xpose.msra.mxu1 %v1462_v52  ;;  %2424 = vmatprep.subr.msk.bf16.mxu0 %vm1118_vm4, %v2561_v51  ;;  %v1838_v51 = vadd.s32 256, %v1836_v48  ;;  %v1837_v52 = vadd.s32 128, %v1836_v48  ;;  %v2991_v54 = vadd.s32 %v1852_v50, %v1836_v48  ;;  %v3000_v2 = vadd.s32 %v1852_v50, %v1840_v55 }
 0x21a   : > { %2432 = vmatprep.subr.msk.bf16.mxu1 %vm1118_vm4, %v2562_v53  ;;  %v1839_v53 = vadd.s32 384, %v1836_v48 }
 0x21b   : > { %v2995_v61 = vadd.s32 %v1852_v50, %v1837_v52  ;;  %vm1869_vm5 = vcmp.lt.s32.totalorder %v2991_v54, 50257  ;;  %vm1873_vm10 = vcmp.lt.s32.totalorder %v3000_v2, 50257 }
 0x21d   : > { %vm1870_vm8 = vcmp.lt.s32.totalorder %v2995_v61, 50257 }
 0x220   : > { %2343 = vmatpush3.bf16.xpose.msra.mxu0 %v1417_v56  ;;  %v1842_v56 = vadd.s32 768, %v1836_v48 }
 0x221   : > { %2361 = vmatpush3.bf16.xpose.msra.mxu1 %v1465_v58  ;;  %2425 = vmatprep.subr.msk.bf16.mxu0 %vm1118_vm4, %v2565_v57  ;;  %v2993_v57 = vadd.s32 %v1852_v50, %v1838_v51  ;;  %v1841_v58 = vadd.s32 640, %v1836_v48 }
 0x222   : > { %2433 = vmatprep.subr.msk.bf16.mxu1 %vm1118_vm4, %v2566_v59  ;;  %v1843_v59 = vadd.s32 896, %v1836_v48  ;;  %v3002_v3 = vadd.s32 %v1852_v50, %v1842_v56 }
 0x223   : > { %vm1871_vm6 = vcmp.lt.s32.totalorder %v2993_v57, 50257 }
 0x224   : > { %vm1875_vm11 = vcmp.lt.s32.totalorder %v3002_v3, 50257 }
 0x228   : > { %2345 = vmatpush3.bf16.xpose.msra.mxu0 %v1420_v62  ;;  %v2997_v62 = vadd.s32 %v1852_v50, %v1839_v53 }
 0x229   : > { %2363 = vmatpush3.bf16.xpose.msra.mxu1 %v1468_v0  ;;  %2426 = vmatprep.subr.msk.bf16.mxu0 %vm1118_vm4, %v2569_v63  ;;  %v1846_v63 = vadd.s32 1280, %v1836_v48  ;;  %v1845_v0 = vadd.s32 1152, %v1836_v48 }
 0x22a   : > { %2434 = vmatprep.subr.msk.bf16.mxu1 %vm1118_vm4, %v2570_v1  ;;  %v1847_v1 = vadd.s32 1408, %v1836_v48  ;;  %vm1872_vm9 = vcmp.lt.s32.totalorder %v2997_v62, 50257 }
 0x22b   : > { %v3017_v9 = vadd.s32 %v1852_v50, %v1845_v0 }
 0x22d   : > { %vm1878_vm0 = vcmp.lt.s32.totalorder %v3017_v9, 50257 }
 0x230   : > { %2347 = vmatpush3.bf16.xpose.msra.mxu0 %v1423_v4  ;;  %v3005_v4 = vadd.s32 %v1852_v50, %v1841_v58 }
 0x231   : > { %2365 = vmatpush3.bf16.xpose.msra.mxu1 %v1471_v6  ;;  %2427 = vmatprep.subr.msk.bf16.mxu0 %vm1118_vm4, %v2573_v5  ;;  %v3007_v5 = vadd.s32 %v1852_v50, %v1843_v59  ;;  %v3009_v6 = vadd.s32 %v1852_v50, %v1844_v60 }
 0x232   : > { %2435 = vmatprep.subr.msk.bf16.mxu1 %vm1118_vm4, %v2574_v7  ;;  %v3013_v7 = vadd.s32 %v1852_v50, %v1846_v63  ;;  %vm1874_vm12 = vcmp.lt.s32.totalorder %v3005_v4, 50257 }
 0x233   : > { %vm1876_vm13 = vcmp.lt.s32.totalorder %v3007_v5, 50257  ;;  %vm1877_vm14 = vcmp.lt.s32.totalorder %v3009_v6, 50257 }
 0x234   : > { %vm1879_vm15 = vcmp.lt.s32.totalorder %v3013_v7, 50257 }
 0x238   : > { %2349 = vmatpush3.bf16.xpose.msra.mxu0 %v1426_v10  ;;  %v3019_v10 = vadd.s32 %v1852_v50, %v1847_v1 }
 0x239   : > { %2367 = vmatpush3.bf16.xpose.msra.mxu1 %v1474_v12  ;;  %2428 = vmatprep.subr.msk.bf16.mxu0 %vm1118_vm4, %v2577_v11  ;;  %v1848_v11 = vadd.s32 1536, %v1836_v48 }
 0x23a   : > { %2436 = vmatprep.subr.msk.bf16.mxu1 %vm1118_vm4, %v2578_v13  ;;  %v1850_v13 = vadd.s32 1792, %v1836_v48  ;;  %vm1880_vm1 = vcmp.lt.s32.totalorder %v3019_v10, 50257 }
 0x240   : > { %2351 = vmatpush3.bf16.xpose.msra.mxu0 %v1429_v16 }
 0x241   : > { %2369 = vmatpush3.bf16.xpose.msra.mxu1 %v1477_v18  ;;  %2429 = vmatprep.subr.msk.bf16.mxu0 %vm1118_vm4, %v2581_v17  ;;  %v1851_v17 = vadd.s32 1920, %v1836_v48 }
 0x242   : > { %2437 = vmatprep.subr.msk.bf16.mxu1 %vm1118_vm4, %v2582_v19  ;;  %v3040_v19 = vadd.s32 %v1852_v50, %v1848_v11 }
 0x244   : > { %vm1881_vm2 = vcmp.lt.s32.totalorder %v3040_v19, 50257 }
 0x248   : > { %2353 = vmatpush3.bf16.xpose.msra.mxu0 %v1432_v22 }
 0x249   : > { %2371 = vmatpush3.bf16.xpose.msra.mxu1 %v1480_v23  ;;  %v3051_v23 = vadd.s32 %v1852_v50, %v1850_v13 }
 0x24b   : > { %vm1883_vm3 = vcmp.lt.s32.totalorder %v3051_v23, 50257 }
 0x24f   : > { %2355 = vmatmul.mubr.msk.bf16.vlgmr.msra.gmra.mrb[12].mxu0 %vm1118_vm4, %v2718_v49 }
 0x250   : > { %2373 = vmatmul.mubr.msk.bf16.vlgmr.msra.gmra.mrb[12].mxu1 %vm1118_vm4, %v2718_v49 }
 0x262   : > { %v1540_v24 = vpop.f32.mrb[0].mxu0 }
 0x263   : > { %v1581_v25 = vpop.f32.mrb[0].mxu1  ;;  %v2970_v26 = vpop.f32.mrb[1].mxu0  ;;  %v3015_v8 = vsel %vm1869_vm5, %v1540_v24, -inf }
 0x264   : > { %v2972_v27 = vpop.f32.mrb[1].mxu1  ;;  %v1544_v28 = vpop.f32.mrb[2].mxu0  ;;  %v3021_v12 = vsel %vm1871_vm6, %v1581_v25, -inf  ;;  %v1902_v15 = vsel %vm3269_vm7, %v3015_v8, -inf  ;;  %v3033_v16 = vsel %vm1870_vm8, %v2970_v26, -inf }
 0x265   : > { %v1585_v29 = vpop.f32.mrb[2].mxu1  ;;  %v1545_v30 = vpop.f32.mrb[3].mxu0  ;;  %v1904_v18 = vsel %vm3269_vm7, %v3021_v12, -inf  ;;  %v1903_v24 = vsel %vm3269_vm7, %v3033_v16, -inf  ;;  %v3058_v25 = vsel %vm1872_vm9, %v2972_v27, -inf  ;;  %v3065_v28 = vadd.s32 %v1852_v50, %v1849_v14 }
 0x266   : > { %v1586_v31 = vpop.f32.mrb[3].mxu1  ;;  %v3078_v27 = vadd.s32 %v1852_v50, %v1851_v17 }
 0x267   : > { %vm1882_vm4 = vcmp.lt.s32.totalorder %v3065_v28, 50257 }
 0x268   : > { %vm1884_vm5 = vcmp.lt.s32.totalorder %v3078_v27, 50257 }
 0x2a2   : > { %v2974_v32 = vpop.f32.mrb[4].mxu0 }
 0x2a3   : > { %v2976_v33 = vpop.f32.mrb[4].mxu1  ;;  %v2978_v34 = vpop.f32.mrb[5].mxu0  ;;  %v3043_v20 = vsel %vm1873_vm10, %v2974_v32, -inf }
 0x2a4   : > { %v2980_v35 = vpop.f32.mrb[5].mxu1  ;;  %v1626_v49 = vpop.f32.mrb[6].mxu0  ;;  %v3046_v21 = vsel %vm1875_vm11, %v2976_v33, -inf  ;;  %v3049_v22 = vsel %vm1874_vm12, %v2978_v34, -inf  ;;  %v1906_v32 = vsel %vm3269_vm7, %v3043_v20, -inf }
 0x2a5   : > { %v1667_v36 = vpop.f32.mrb[6].mxu1  ;;  %v1627_v37 = vpop.f32.mrb[7].mxu0  ;;  %v3063_v26 = vsel %vm1876_vm13, %v2980_v35, -inf  ;;  %v1910_v33 = vsel %vm3269_vm7, %v3046_v21, -inf  ;;  %v1908_v34 = vsel %vm3269_vm7, %v3049_v22, -inf  ;;  %v1905_v49 = vsel %vm3269_vm7, %v3058_v25, -inf }
 0x2a6   : > { %v1668_v38 = vpop.f32.mrb[7].mxu1  ;;  %v1912_v36 = vsel %vm3269_vm7, %v3063_v26, -inf }
 0x2e2   : > { %v2982_v39 = vpop.f32.mrb[8].mxu0 }
 0x2e3   : > { %v2984_v40 = vpop.f32.mrb[8].mxu1  ;;  %v2986_v41 = vpop.f32.mrb[9].mxu0  ;;  %v3070_v29 = vsel %vm1877_vm14, %v2982_v39, -inf }
 0x2e4   : > { %v2988_v42 = vpop.f32.mrb[9].mxu1  ;;  %v1708_v43 = vpop.f32.mrb[10].mxu0  ;;  %v3073_v30 = vsel %vm1879_vm15, %v2984_v40, -inf  ;;  %v3076_v31 = vsel %vm1878_vm0, %v2986_v41, -inf  ;;  %v1914_v37 = vsel %vm3269_vm7, %v3070_v29, -inf  ;;  %v1907_v40 = vmax.f32 %v1902_v15, %v1906_v32 }
 0x2e5   : > { %v1749_v44 = vpop.f32.mrb[10].mxu1  ;;  %v1709_v45 = vpop.f32.mrb[11].mxu0  ;;  %v3089_v35 = vsel %vm1880_vm1, %v2988_v42, -inf  ;;  %v1918_v38 = vsel %vm3269_vm7, %v3073_v30, -inf  ;;  %v1916_v39 = vsel %vm3269_vm7, %v3076_v31, -inf  ;;  %v1911_v41 = vmax.f32 %v1904_v18, %v1910_v33 }
 0x2e6   : > { %v1750_v46 = vpop.f32.mrb[11].mxu1  ;;  %v1909_v42 = vmax.f32 %v1903_v24, %v1908_v34  ;;  %v1920_v43 = vsel %vm3269_vm7, %v3089_v35, -inf  ;;  %v1913_v44 = vmax.f32 %v1905_v49, %v1912_v36 }
 0x2e7   : > { %v1915_v46 = vmax.f32 %v1907_v40, %v1914_v37  ;;  %v1919_v47 = vmax.f32 %v1911_v41, %v1918_v38 }
 0x2e8   : > { %v1917_v48 = vmax.f32 %v1909_v42, %v1916_v39  ;;  %v1921_v53 = vmax.f32 %v1913_v44, %v1920_v43 }
 0x322   : > { %v1786_v45 = vpop.f32.mrb[12].mxu0 }
 0x323   : > { %v1897_v50 = vsel %vm1881_vm2, %v1786_v45, -inf  ;;  %v1827_v51 = vpop.f32.mrb[12].mxu1  ;;  %v1788_v52 = vpop.f32.mrb[13].mxu0 }
 0x324   : > { %v1922_v55 = vsel %vm3269_vm7, %v1897_v50, -inf  ;;  %v1899_v56 = vsel %vm1883_vm3, %v1827_v51, -inf  ;;  %v1898_v58 = vsel %vm1882_vm4, %v1788_v52, -inf  ;;  %v1829_v59 = vpop.f32.mrb[13].mxu1  ;;  %v1790_v60 = vpop.f32.mrb[14].mxu0 }
 0x325   : > { %v1923_v63 = vmax.f32 %v1915_v46, %v1922_v55  ;;  %v1926_v0 = vsel %vm3269_vm7, %v1899_v56, -inf  ;;  %v1924_v1 = vsel %vm3269_vm7, %v1898_v58, -inf  ;;  %v1900_v11 = vsel %vm1884_vm5, %v1829_v59, -inf  ;;  %v1831_v13 = vpop.f32.mrb[14].mxu1  ;;  %v1791_v14 = vpop.f32.mrb[15].mxu0 }
 0x326   : > { %v1927_v15 = vmax.f32 %v1919_v47, %v1926_v0  ;;  %v1925_v17 = vmax.f32 %v1917_v48, %v1924_v1  ;;  %v1928_v18 = vsel %vm3269_vm7, %v1900_v11, -inf  ;;  %v1832_v24 = vpop.f32.mrb[15].mxu1 }
 0x327   : > { %v1929_v32 = vmax.f32 %v1921_v53, %v1928_v18 }
 0x328   : > { %v1930_v33 = vmax.f32 %v1923_v63, %v1925_v17 }
 0x329   : > { %v1931_v34 = vmax.f32 %v1927_v15, %v1929_v32 }
 0x32b   : > { %v1932_v49 = vmax.f32 %v1930_v33, %v1931_v34  ;;  %v2029_v33 = vld [vmem:[#allocation4] sm:$0x1] }
 0x32d   : > { %1933 = vmax.xlane.f32.xlu0 %v1932_v49 }
 0x3ba   : > { %v3119_v36 = vpop.xlane.xlu0 %1933 }
 0x3bb   : > { %vm1935_vm8 = vcmp.eq.f32.partialorder %v3015_v8, %v3119_v36  ;;  %vm1936_vm9 = vcmp.eq.f32.partialorder %v3033_v16, %v3119_v36  ;;  %vm1937_vm10 = vcmp.eq.f32.partialorder %v3021_v12, %v3119_v36  ;;  %vm1938_vm11 = vcmp.eq.f32.partialorder %v3058_v25, %v3119_v36  ;;  %v3181_v8 = vld [vmem:[#allocation2] sm:$0x1] }
 0x3bc   : > { %vm1939_vm12 = vcmp.eq.f32.partialorder %v3043_v20, %v3119_v36  ;;  %vm1940_vm13 = vcmp.eq.f32.partialorder %v3049_v22, %v3119_v36  ;;  %vm1941_vm14 = vcmp.eq.f32.partialorder %v3046_v21, %v3119_v36  ;;  %vm1942_vm15 = vcmp.eq.f32.partialorder %v3063_v26, %v3119_v36  ;;  %v2033_v12 = vld [vmem:[#allocation2] sm:$0x1] }
 0x3bd   : > { %vm1943_vm0 = vcmp.eq.f32.partialorder %v3070_v29, %v3119_v36  ;;  %vm1944_vm1 = vcmp.eq.f32.partialorder %v3076_v31, %v3119_v36  ;;  %vm1945_vm2 = vcmp.eq.f32.partialorder %v3073_v30, %v3119_v36  ;;  %vm1946_vm3 = vcmp.eq.f32.partialorder %v3089_v35, %v3119_v36 }
 0x3be   : > { %vm1947_vm4 = vcmp.eq.f32.partialorder %v1897_v50, %v3119_v36  ;;  %vm1948_vm5 = vcmp.eq.f32.partialorder %v1898_v58, %v3119_v36  ;;  %vm1949_vm6 = vcmp.eq.f32.partialorder %v1899_v56, %v3119_v36  ;;  %vm1950_vm7 = vcmp.eq.f32.partialorder %v1900_v11, %v3119_v36 }
 0x3bf   : > { %v1951_v37 = vsel %vm1935_vm8, %v2991_v54, 1073741824  ;;  %v1952_v38 = vsel %vm1936_vm9, %v2995_v61, 1073741824  ;;  %v1953_v39 = vsel %vm1937_vm10, %v2993_v57, 1073741824  ;;  %v1954_v40 = vsel %vm1938_vm11, %v2997_v62, 1073741824 }
 0x3c0   : > { %v1955_v54 = vsel %vm1939_vm12, %v3000_v2, 1073741824  ;;  %v1956_v61 = vsel %vm1940_vm13, %v3005_v4, 1073741824  ;;  %v1957_v57 = vsel %vm1941_vm14, %v3002_v3, 1073741824  ;;  %v1958_v62 = vsel %vm1942_vm15, %v3007_v5, 1073741824 }
 0x3c1   : > { %v1959_v2 = vsel %vm1943_vm0, %v3009_v6, 1073741824  ;;  %v1960_v4 = vsel %vm1944_vm1, %v3017_v9, 1073741824  ;;  %v1961_v3 = vsel %vm1945_vm2, %v3013_v7, 1073741824  ;;  %v1962_v5 = vsel %vm1946_vm3, %v3019_v10, 1073741824 }
 0x3c2   : > { %v1963_v6 = vsel %vm1947_vm4, %v3040_v19, 1073741824  ;;  %v1964_v16 = vsel %vm1948_vm5, %v3065_v28, 1073741824  ;;  %v1965_v9 = vsel %vm1949_vm6, %v3051_v23, 1073741824  ;;  %v1966_v7 = vsel %vm1950_vm7, %v3078_v27, 1073741824 }
 0x3c3   : > { %vm3270_vm8 = vcmask 1040384   ;;  %vm2028_vm11 = vcmp.gt.f32.partialorder %v3119_v36, %v3181_v8  ;;  %vm3278_vm1 = vcmask 0  }
 0x3c4   : > { %v1967_v20 = vsel %vm3270_vm8, %v1951_v37, 2147483647  ;;  %vm3271_vm9 = vmmov %vm3270_vm8  ;;  %v2034_v23 = vsel %vm2028_vm11, %v3119_v36, %v2033_v12 }
 0x3c5   : > { %v1968_v10 = vsel %vm3271_vm9, %v1952_v38, 2147483647  ;;  %vm3272_vm10 = vmmov %vm3270_vm8  ;;  %2035 = vst.msk [vmem:[#allocation2] sm:$0x1] %vm3278_vm1, %v2034_v23 }
 0x3c6   : > { %v1969_v21 = vsel %vm3272_vm10, %v1953_v39, 2147483647  ;;  %vm3273_vm12 = vmmov %vm3270_vm8 }
 0x3c7   : > { %v1970_v19 = vsel %vm3273_vm12, %v1954_v40, 2147483647  ;;  %vm3274_vm13 = vmmov %vm3270_vm8 }
 0x3c8   : > { %v1971_v22 = vsel %vm3274_vm13, %v1955_v54, 2147483647  ;;  %vm3275_vm14 = vmmov %vm3270_vm8 }
 0x3c9   : > { %v1974_v25 = vsel %vm3275_vm14, %v1956_v61, 2147483647  ;;  %vm1972_vm7 = vcmp.lt.s32.totalorder %v1967_v20, %v1971_v22  ;;  %vm3276_vm15 = vmmov %vm3270_vm8 }
 0x3ca   : > { %vm1975_vm6 = vcmp.lt.s32.totalorder %v1968_v10, %v1974_v25  ;;  %v1977_v26 = vsel %vm3276_vm15, %v1957_v57, 2147483647  ;;  %vm3277_vm0 = vmmov %vm3270_vm8  ;;  %v1973_v29 = vsel %vm1972_vm7, %v1967_v20, %v1971_v22 }
 0x3cb   : > { %v1980_v28 = vsel %vm3277_vm0, %v1958_v62, 2147483647  ;;  %v1976_v30 = vsel %vm1975_vm6, %v1968_v10, %v1974_v25  ;;  %vm1978_vm2 = vcmp.lt.s32.totalorder %v1969_v21, %v1977_v26  ;;  %vm3279_vm4 = vmmov %vm3277_vm0 }
 0x3cc   : > { %vm1981_vm3 = vcmp.lt.s32.totalorder %v1970_v19, %v1980_v28  ;;  %v1979_v31 = vsel %vm1978_vm2, %v1969_v21, %v1977_v26  ;;  %v1983_v35 = vsel %vm3279_vm4, %v1959_v2, 2147483647  ;;  %vm3280_vm5 = vmmov %vm3277_vm0 }
 0x3cd   : > { %v1982_v27 = vsel %vm1981_vm3, %v1970_v19, %v1980_v28  ;;  %v1986_v41 = vsel %vm3280_vm5, %v1960_v4, 2147483647  ;;  %vm1984_vm8 = vcmp.lt.s32.totalorder %v1973_v29, %v1983_v35  ;;  %vm3281_vm10 = vmmov %vm3277_vm0 }
 0x3ce   : > { %vm1987_vm9 = vcmp.lt.s32.totalorder %v1976_v30, %v1986_v41  ;;  %v1989_v42 = vsel %vm3281_vm10, %v1961_v3, 2147483647  ;;  %vm3282_vm12 = vmmov %vm3277_vm0  ;;  %v1985_v44 = vsel %vm1984_vm8, %v1973_v29, %v1983_v35 }
 0x3cf   : > { %v1992_v43 = vsel %vm3282_vm12, %v1962_v5, 2147483647  ;;  %v1988_v45 = vsel %vm1987_vm9, %v1976_v30, %v1986_v41  ;;  %vm1990_vm13 = vcmp.lt.s32.totalorder %v1979_v31, %v1989_v42  ;;  %vm3283_vm7 = vmmov %vm3277_vm0  ;;  %vm3287_vm12 = vcmask 0  }
 0x3d0   : > { %vm1993_vm14 = vcmp.lt.s32.totalorder %v1982_v27, %v1992_v43  ;;  %v1991_v46 = vsel %vm1990_vm13, %v1979_v31, %v1989_v42  ;;  %v1995_v48 = vsel %vm3283_vm7, %v1963_v6, 2147483647  ;;  %vm3284_vm6 = vmmov %vm3277_vm0 }
 0x3d1   : > { %v1994_v47 = vsel %vm1993_vm14, %v1982_v27, %v1992_v43  ;;  %v1998_v50 = vsel %vm3284_vm6, %v1964_v16, 2147483647  ;;  %vm1996_vm15 = vcmp.lt.s32.totalorder %v1985_v44, %v1995_v48  ;;  %vm3285_vm1 = vmmov %vm3279_vm4 }
 0x3d2   : > { %vm1999_vm0 = vcmp.lt.s32.totalorder %v1988_v45, %v1998_v50  ;;  %v2001_v51 = vsel %vm3285_vm1, %v1965_v9, 2147483647  ;;  %vm3286_vm2 = vmmov %vm3285_vm1  ;;  %v1997_v53 = vsel %vm1996_vm15, %v1985_v44, %v1995_v48 }
 0x3d3   : > { %v2004_v52 = vsel %vm3286_vm2, %v1966_v7, 2147483647  ;;  %v2000_v55 = vsel %vm1999_vm0, %v1988_v45, %v1998_v50  ;;  %vm2002_vm3 = vcmp.lt.s32.totalorder %v1991_v46, %v2001_v51 }
 0x3d4   : > { %vm2005_vm4 = vcmp.lt.s32.totalorder %v1994_v47, %v2004_v52  ;;  %v2003_v56 = vsel %vm2002_vm3, %v1991_v46, %v2001_v51  ;;  %vm2007_vm5 = vcmp.lt.s32.totalorder %v1997_v53, %v2000_v55 }
 0x3d5   : > { %v2006_v58 = vsel %vm2005_vm4, %v1994_v47, %v2004_v52  ;;  %v2008_v59 = vsel %vm2007_vm5, %v1997_v53, %v2000_v55 }
 0x3d6   : > { %vm2009_vm8 = vcmp.lt.s32.totalorder %v2003_v56, %v2006_v58 }
 0x3d7   : > { %v2010_v60 = vsel %vm2009_vm8, %v2003_v56, %v2006_v58 }
 0x3d8   : > { %vm2011_vm9 = vcmp.lt.s32.totalorder %v2008_v59, %v2010_v60 }
 0x3d9   : > { %v2012_v63 = vsel %vm2011_vm9, %v2008_v59, %v2010_v60 }
 0x3da   : > { %v2014_v0 = vshra.s32 %v2012_v63, 16  ;;  %v2013_v11 = vand.u32 65535, %v2012_v63 }
 0x3dc   : > { %v2016_v1 = vcvt.s32.f32 %v2014_v0  ;;  %v2015_v14 = vcvt.s32.f32 %v2013_v11 }
 0x3de   : > { %2017 = vmin.xlane.f32.xlu0 %v2016_v1 }
 0x46b   : > { %v2018_v13 = vpop.xlane.xlu0 %2017 }
 0x46c   : > { %vm2019_vm10 = vcmp.eq.f32.partialorder %v2016_v1, %v2018_v13  ;;  %v2024_v17 = vcvt.f32.s32 %v2018_v13 }
 0x46d   : > { %v2020_v15 = vsel %vm2019_vm10, %v2015_v14, inf }
 0x46e   : > { %2021 = vmin.xlane.f32.xlu1 %v2020_v15  ;;  %v2025_v24 = vshll.u32 %v2024_v17, 16 }
 0x4fb   : > { %v2022_v18 = vpop.xlane.xlu1 %2021 }
 0x4fc   : > { %v2023_v32 = vcvt.f32.s32 %v2022_v18 }
 0x4fe   : > { %v2026_v34 = vadd.s32 %v2025_v24, %v2023_v32 }
 0x500   : > { %v2030_v49 = vsel %vm2028_vm11, %v2026_v34, %v2029_v33 }
 0x501   : > { %2032 = vst.msk [vmem:[#allocation4] sm:$0x1] %vm3287_vm12, %v2030_v49 }
 0x502   : > { %2598 = shalt.err (!%p2595_p12)
}
 0x503   : > { %s2599_s9 = scalar_lea.hbm %s3268_s4, 16 }
 0x504   : > { %p2600_p13 = scmp.ne.s32.totalorder %s3268_s4, %s2599_s9  ;;  %p2605_p2 = scmp.lt.u32.totalorder %s2599_s9, %s3268_s4 }
 0x506   : > { %p2601_p0 = pnand %p2600_p13, %p2442_p5 }
 0x508   : > { %p2602_p1 = pneg %p2601_p0 }
 0x50a   : > { %p2607_p3 = pnand %p2605_p2, %p2602_p1 }
 0x50c   : > { %2610 = shalt.err (!%p2607_p3)
}
 0x50d   : > { %2439 = dma.vmem_to_hbm [thread:$0]  (%p2442_p5), %s2044_s30, 16, %s3268_s4, [#allocation5]  }
 0x50e   : > { %2616 = dma.done.wait (%p2442_p5), [#allocation5], 16  }
 0x50f   : > { %2618 = vsyncadd (%p2442_p5), [#allocation5], 4294967280 }
 0x510 PF: > { %s15_s15 = sadd.s32 1, %s2621_s15  }
 0x511   : > { %p12_p4 = scmp.ge.s32.totalorder %s15_s15, 27  }
 0x513   :  { %14 = sbr.rel (!%p12_p4) target bundleno = 1 (0x1), region = 67 }
 0x51a   :  { %2056 = vsyncpa [#allocation5], 1 }
 0x51b   :  { %2058 = vsyncpa [#allocation5 + $0x1], 1 }

</bundles_post_ra>
